<compile_context>
chip_gen: v7x
topology: tpu7x:2x2x1
jax: 0.10.0
libtpu: 0.0.40
codegen_flags: <defaults>
</compile_context>

<pallas_src>
import functools

import jax
import jax.numpy as jnp
import numpy as np
from jax import lax
from jax.experimental import pallas as pl
from jax.experimental.pallas import tpu as pltpu

PAD_IDX = 1  # hp.pad_idx
_HIGH = jax.lax.Precision.HIGHEST


def _round_up(x, m):
    return (x + m - 1) // m * m


# ----------------------------------------------------------------------------
# Pallas kernel: one GRU layer, BOTH directions, chunked time recurrence.
#   grid = (2 directions [parallel], n_chunks [arbitrary/sequential])
#   gi (input projection) is precomputed outside; only h @ W_hh stays serial.
# ----------------------------------------------------------------------------
def _bigru_kernel(gi_ref, h0_ref, whh_ref, bhh_ref, out_ref, hT_ref, h_scratch,
                  *, t_real, n_chunks):
    d = pl.program_id(0)            # direction: 0 = forward, 1 = backward
    c = pl.program_id(1)            # chunk index in processing order
    tc = out_ref.shape[0]           # timesteps per chunk (static)
    hpad = out_ref.shape[-1]        # padded hidden width (multiple of 128)

    @pl.when(c == 0)
    def _():                        # (re)load initial hidden at the start of each direction
        h_scratch[...] = h0_ref[...]

    whh = whh_ref[...]              # (Hp, 3Hp) resident across the chunk sweep
    bhh = bhh_ref[...]              # (1, 3Hp)

    # which time-chunk this block maps to (fwd: c, bwd: n_chunks-1-c)
    t_chunk = c + d * (n_chunks - 1 - 2 * c)
    need_mask = (n_chunks * tc) != t_real   # static: only if T was padded

    def step(s, h):
        # local time inside the chunk (fwd: s, bwd: tc-1-s)
        lt = s + d * (tc - 1 - 2 * s)
        gi = gi_ref[lt]                                          # (Bp, 3Hp) precomputed
        gh = jnp.dot(h, whh, preferred_element_type=jnp.float32) + bhh
        r = jax.nn.sigmoid(gi[:, 0:hpad] + gh[:, 0:hpad])
        z = jax.nn.sigmoid(gi[:, hpad:2 * hpad] + gh[:, hpad:2 * hpad])
        n = jnp.tanh(gi[:, 2 * hpad:3 * hpad] + r * gh[:, 2 * hpad:3 * hpad])
        h_new = (1.0 - z) * n + z * h
        if need_mask:
            t_global = t_chunk * tc + lt
            h_new = jnp.where(t_global < t_real, h_new, h)       # padded steps: carry h
        out_ref[lt] = h_new
        return h_new

    h_final = lax.fori_loop(0, tc, step, h_scratch[...], unroll=True)
    h_scratch[...] = h_final

    @pl.when(c == n_chunks - 1)     # single gated store of the final hidden state
    def _():
        hT_ref[...] = h_final


def _bigru_pallas(gi, h0, whh, bhh, *, t_real, tc):
    """gi: (2, Tpad, Bp, 3Hp), h0: (2, Bp, Hp), whh: (2, Hp, 3Hp), bhh: (2, 1, 3Hp)."""
    _, t_pad, bp, g3 = gi.shape
    hpad = g3 // 3
    n_chunks = t_pad // tc

    kernel = functools.partial(_bigru_kernel, t_real=t_real, n_chunks=n_chunks)
    time_map = lambda d, c: (d, c + d * (n_chunks - 1 - 2 * c), 0, 0)
    dir_map3 = lambda d, c: (d, 0, 0)

    out, h_t = pl.pallas_call(
        kernel,
        out_shape=(
            jax.ShapeDtypeStruct((2, t_pad, bp, hpad), jnp.float32),
            jax.ShapeDtypeStruct((2, bp, hpad), jnp.float32),
        ),
        grid_spec=pltpu.PrefetchScalarGridSpec(
            num_scalar_prefetch=0,
            grid=(2, n_chunks),
            in_specs=[
                pl.BlockSpec((None, tc, bp, g3), time_map),     # precomputed gi
                pl.BlockSpec((None, bp, hpad), dir_map3),       # h0
                pl.BlockSpec((None, hpad, g3), dir_map3),       # W_hh (padded, transposed)
                pl.BlockSpec((None, 1, g3), dir_map3),          # b_hh
            ],
            out_specs=[
                pl.BlockSpec((None, tc, bp, hpad), time_map),   # per-timestep outputs
                pl.BlockSpec((None, bp, hpad), dir_map3),       # final hidden
            ],
            scratch_shapes=[pltpu.VMEM((bp, hpad), jnp.float32)],
        ),
        compiler_params=pltpu.CompilerParams(
            dimension_semantics=("parallel", "arbitrary")),
    )(gi, h0, whh, bhh)
    return out, h_t


# ----------------------------------------------------------------------------
# Padding / weight-prep helpers (per-gate lane padding to multiples of 128)
# ----------------------------------------------------------------------------
def _pad_gates_gi(gi, H, Hp, Tpad, Bp):
    T, B, _ = gi.shape
    out = jnp.zeros((Tpad, Bp, 3 * Hp), jnp.float32)
    for g in range(3):
        out = out.at[:T, :B, g * Hp:g * Hp + H].set(gi[:, :, g * H:(g + 1) * H])
    return out


def _prep_whh(w_hh, H, Hp):
    wt = jnp.transpose(w_hh)                       # (H, 3H): lane-major matmul layout
    out = jnp.zeros((Hp, 3 * Hp), jnp.float32)
    for g in range(3):
        out = out.at[:H, g * Hp:g * Hp + H].set(wt[:, g * H:(g + 1) * H])
    return out


def _prep_bhh(b_hh, H, Hp):
    out = jnp.zeros((1, 3 * Hp), jnp.float32)
    for g in range(3):
        out = out.at[0, g * Hp:g * Hp + H].set(b_hh[g * H:(g + 1) * H])
    return out


def _pad_h(h, Bp, Hp):
    B, H = h.shape
    return jnp.zeros((Bp, Hp), jnp.float32).at[:B, :H].set(h)


# ----------------------------------------------------------------------------
# Encoder forward (embedding gather + hoisted projections + bi-GRU stack)
# ----------------------------------------------------------------------------
def encoder_forward(params, source, hidden=None, *, chunk_len=16):
    embedding = params["embedding"]
    n_layers = params["n_layers"]
    H = params["hidden_dim"]

    embedded = embedding[source].astype(jnp.float32)     # (T, B, E) gather glue
    T, B, _ = embedded.shape

    if hidden is None:
        hidden = jnp.zeros((n_layers * 2, B, H), jnp.float32)

    Hp = _round_up(H, 128)
    Bp = _round_up(B, 8)
    Tc = min(T, chunk_len)
    Tpad = pl.cdiv(T, Tc) * Tc

    fwd_prev = bwd_prev = None
    h_n = []
    for layer in range(n_layers):
        gi_dir, h0_dir, whh_dir, bhh_dir = [], [], [], []
        for d in range(2):
            w_ih = params[f"w_ih_l{layer}_d{d}"]          # (3H, F_in)
            b_ih = params[f"b_ih_l{layer}_d{d}"]          # (3H,)
            if layer == 0:
                gi = jnp.einsum('tbf,gf->tbg', embedded, w_ih, precision=_HIGH) + b_ih
            else:
                # no concat: split W_ih columns over the two direction outputs
                gi = (jnp.einsum('tbh,gh->tbg', fwd_prev, w_ih[:, :H], precision=_HIGH)
                      + jnp.einsum('tbh,gh->tbg', bwd_prev, w_ih[:, H:], precision=_HIGH)
                      + b_ih)
            gi_dir.append(_pad_gates_gi(gi, H, Hp, Tpad, Bp))
            h0_dir.append(_pad_h(hidden[layer * 2 + d], Bp, Hp))
            whh_dir.append(_prep_whh(params[f"w_hh_l{layer}_d{d}"], H, Hp))
            bhh_dir.append(_prep_bhh(params[f"b_hh_l{layer}_d{d}"], H, Hp))

        out, hT = _bigru_pallas(
            jnp.stack(gi_dir, 0), jnp.stack(h0_dir, 0),
            jnp.stack(whh_dir, 0), jnp.stack(bhh_dir, 0),
            t_real=T, tc=Tc)

        fwd_prev = out[0, :T, :B, :H]
        bwd_prev = out[1, :T, :B, :H]
        h_n.append(hT[0, :B, :H])
        h_n.append(hT[1, :B, :H])
        # TODO(synk): inter-layer dropout (p=0.2) is training-mode only; eval forward omits it.

    encoder_final = fwd_prev + bwd_prev                   # h^fwd + h^bwd of last layer
    encoder_hidden = jnp.stack(h_n, axis=0)               # (n_layers*2, B, H), PyTorch order
    return encoder_final, encoder_hidden


# ----------------------------------------------------------------------------
# Pure-JAX reference (mirrors torch.nn.GRU math)
# ----------------------------------------------------------------------------
def _ref_gru_dir(x, h0, w_ih, w_hh, b_ih, b_hh, reverse):
    T = x.shape[0]
    H = h0.shape[-1]
    h = h0
    outs = [None] * T
    order = range(T - 1, -1, -1) if reverse else range(T)
    for t in order:
        gi = jnp.dot(x[t], w_ih.T, precision=_HIGH) + b_ih
        gh = jnp.dot(h, w_hh.T, precision=_HIGH) + b_hh
        r = jax.nn.sigmoid(gi[:, :H] + gh[:, :H])
        z = jax.nn.sigmoid(gi[:, H:2 * H] + gh[:, H:2 * H])
        n = jnp.tanh(gi[:, 2 * H:] + r * gh[:, 2 * H:])
        h = (1.0 - z) * n + z * h
        outs[t] = h
    return jnp.stack(outs, 0), h


def encoder_forward_ref(params, source, hidden=None):
    embedding = params["embedding"]
    n_layers = params["n_layers"]
    H = params["hidden_dim"]
    embedded = embedding[source]
    T, B, _ = embedded.shape
    if hidden is None:
        hidden = jnp.zeros((n_layers * 2, B, H), jnp.float32)
    x = embedded
    h_n = []
    for layer in range(n_layers):
        dir_outs = []
        for d in range(2):
            out, h_T = _ref_gru_dir(
                x, hidden[layer * 2 + d],
                params[f"w_ih_l{layer}_d{d}"], params[f"w_hh_l{layer}_d{d}"],
                params[f"b_ih_l{layer}_d{d}"], params[f"b_hh_l{layer}_d{d}"],
                reverse=(d == 1))
            dir_outs.append(out)
            h_n.append(h_T)
        x = jnp.concatenate(dir_outs, axis=-1)
    return x[:, :, :H] + x[:, :, H:], jnp.stack(h_n, 0)


# ----------------------------------------------------------------------------
# Deterministic parameter construction (mirrors Encoder.__init__ shapes)
# ----------------------------------------------------------------------------
def make_params(key, vocab, embed_dim, hidden_dim, n_layers):
    params = {"hidden_dim": hidden_dim, "n_layers": n_layers}
    key, k_emb = jax.random.split(key)
    emb = jax.random.uniform(k_emb, (vocab, embed_dim), jnp.float32, -0.1, 0.1)
    emb = emb.at[PAD_IDX].set(0.0)                        # padding_idx=hp.pad_idx
    params["embedding"] = emb
    for layer in range(n_layers):
        in_dim = embed_dim if layer == 0 else 2 * hidden_dim
        for d in range(2):
            key, k1, k2, k3, k4 = jax.random.split(key, 5)
            params[f"w_ih_l{layer}_d{d}"] = jax.random.uniform(
                k1, (3 * hidden_dim, in_dim), jnp.float32, -0.1, 0.1)
            params[f"w_hh_l{layer}_d{d}"] = jax.random.uniform(
                k2, (3 * hidden_dim, hidden_dim), jnp.float32, -0.1, 0.1)
            params[f"b_ih_l{layer}_d{d}"] = jax.random.uniform(
                k3, (3 * hidden_dim,), jnp.float32, -0.1, 0.1)
            params[f"b_hh_l{layer}_d{d}"] = jax.random.uniform(
                k4, (3 * hidden_dim,), jnp.float32, -0.1, 0.1)
    return params


def _check(params, source, hidden, chunk_len, T, B, H, n_layers):
    enc_final, enc_hidden = encoder_forward(params, source, hidden, chunk_len=chunk_len)
    enc_final = jax.block_until_ready(enc_final)
    enc_hidden = jax.block_until_ready(enc_hidden)
    assert enc_final.shape == (T, B, H)
    assert enc_hidden.shape == (n_layers * 2, B, H)
    ref_final, ref_hidden = encoder_forward_ref(params, source, hidden)
    # f32 path end to end; tolerance left at 1e-3 to absorb MXU multi-pass vs
    # XLA-HIGHEST accumulation-order differences in the recurrent matmuls.
    np.testing.assert_allclose(np.asarray(enc_final), np.asarray(ref_final),
                               rtol=1e-3, atol=1e-3)
    np.testing.assert_allclose(np.asarray(enc_hidden), np.asarray(ref_hidden),
                               rtol=1e-3, atol=1e-3)


if __name__ == "__main__":
    vocab, embed_dim, hidden_dim, n_layers = 50, 32, 32, 2

    root = jax.random.PRNGKey(0)
    k_params, k_src1, k_src2, k_h0 = jax.random.split(root, 4)
    params = make_params(k_params, vocab, embed_dim, hidden_dim, n_layers)

    # Config 1: T fits in one chunk (no time padding), default zero initial hidden.
    T1, B1 = 8, 4
    src1 = jax.random.randint(k_src1, (T1, B1), 0, vocab, dtype=jnp.int32)
    src1 = src1.at[-1, :].set(PAD_IDX)
    _check(params, src1, None, 16, T1, B1, hidden_dim, n_layers)

    # Config 2: multi-chunk + ragged T (T=13, Tc=8 -> Tpad=16, 3 masked steps),
    # nonzero initial hidden to exercise the h0 / masking path.
    T2, B2 = 13, 4
    src2 = jax.random.randint(k_src2, (T2, B2), 0, vocab, dtype=jnp.int32)
    src2 = src2.at[-1, :].set(PAD_IDX)
    h0 = jax.random.uniform(k_h0, (n_layers * 2, B2, hidden_dim), jnp.float32, -0.1, 0.1)
    _check(params, src2, h0, 8, T2, B2, hidden_dim, n_layers)

    print("KERNEL_OK")
</pallas_src>

<mosaic_0001>
module attributes {stable_mosaic.version = 11 : i64} {
  func.func @_bigru_kernel(%arg0: i32, %arg1: i32, %arg2: memref<1x8x8x384xf32, #tpu.memory_space<vmem>>, %arg3: memref<1x8x128xf32, #tpu.memory_space<vmem>>, %arg4: memref<1x128x384xf32, #tpu.memory_space<vmem>>, %arg5: memref<1x1x384xf32, #tpu.memory_space<vmem>>, %arg6: memref<1x8x8x128xf32, #tpu.memory_space<vmem>>, %arg7: memref<1x8x128xf32, #tpu.memory_space<vmem>>, %arg8: memref<8x128xf32, #tpu.memory_space<vmem>>) attributes {dimension_semantics = [#tpu.dimension_semantics<parallel>, #tpu.dimension_semantics<arbitrary>], iteration_bounds = array<i64: 2, 1>, scalar_prefetch = 0 : i64, scratch_operands = 1 : i64, tpu.core_type = #tpu.core_type<tc>, window_params = [{transform_indices = @transform_0, window_bounds = array<i64: 1, 8, 8, 384>}, {transform_indices = @transform_1, window_bounds = array<i64: 1, 8, 128>}, {transform_indices = @transform_2, window_bounds = array<i64: 1, 128, 384>}, {transform_indices = @transform_3, window_bounds = array<i64: 1, 1, 384>}, {transform_indices = @transform_4, window_bounds = array<i64: 1, 8, 8, 128>}, {transform_indices = @transform_5, window_bounds = array<i64: 1, 8, 128>}]} {
    %c0_i32 = arith.constant 0 : i32
    %0 = arith.cmpi eq, %arg1, %c0_i32 : i32
    %1 = arith.extui %0 : i1 to i32
    %c0_i32_0 = arith.constant 0 : i32
    %2 = arith.cmpi ne, %1, %c0_i32_0 : i32
    scf.if %2 {
      %c0_108 = arith.constant 0 : index
      %c0_109 = arith.constant 0 : index
      %c0_110 = arith.constant 0 : index
      %332 = vector.load %arg3[%c0_108, %c0_109, %c0_110] : memref<1x8x128xf32, #tpu.memory_space<vmem>>, vector<1x8x128xf32>
      %333 = vector.shape_cast %332 : vector<1x8x128xf32> to vector<8x128xf32>
      %c0_111 = arith.constant 0 : index
      %c0_112 = arith.constant 0 : index
      %334 = vector.load %arg8[%c0_111, %c0_112] : memref<8x128xf32, #tpu.memory_space<vmem>>, vector<8x128xf32>
      tpu.vector_store %arg8[%c0_111, %c0_112], %333 {strides = array<i32>} : memref<8x128xf32, #tpu.memory_space<vmem>>, vector<8x128xf32>,
    } else {
    }
    %c0 = arith.constant 0 : index
    %c0_1 = arith.constant 0 : index
    %c0_2 = arith.constant 0 : index
    %3 = vector.load %arg4[%c0, %c0_1, %c0_2] : memref<1x128x384xf32, #tpu.memory_space<vmem>>, vector<1x128x384xf32>
    %4 = vector.shape_cast %3 : vector<1x128x384xf32> to vector<128x384xf32>
    %c0_3 = arith.constant 0 : index
    %c0_4 = arith.constant 0 : index
    %c0_5 = arith.constant 0 : index
    %5 = vector.load %arg5[%c0_3, %c0_4, %c0_5] : memref<1x1x384xf32, #tpu.memory_space<vmem>>, vector<1x1x384xf32>
    %6 = vector.shape_cast %5 : vector<1x1x384xf32> to vector<1x384xf32>
    %c0_6 = arith.constant 0 : index
    %c0_7 = arith.constant 0 : index
    %7 = vector.load %arg8[%c0_6, %c0_7] : memref<8x128xf32, #tpu.memory_space<vmem>>, vector<8x128xf32>
    %c0_i32_8 = arith.constant 0 : i32
    %c2_i32 = arith.constant 2 : i32
    %8 = arith.muli %c2_i32, %c0_i32_8 : i32
    %c7_i32 = arith.constant 7 : i32
    %9 = arith.subi %c7_i32, %8 : i32
    %10 = arith.muli %arg0, %9 : i32
    %11 = arith.addi %c0_i32_8, %10 : i32
    %c0_9 = arith.constant 0 : index
    %12 = arith.index_cast %11 : i32 to index
    %c0_10 = arith.constant 0 : index
    %c0_11 = arith.constant 0 : index
    %13 = vector.load %arg2[%c0_9, %12, %c0_10, %c0_11] : memref<1x8x8x384xf32, #tpu.memory_space<vmem>>, vector<1x1x8x384xf32>
    %14 = vector.shape_cast %13 : vector<1x1x8x384xf32> to vector<8x384xf32>
    %cst = arith.constant dense<0.000000e+00> : vector<8x384xf32>
    %15 = tpu.matmul %7, %4, %cst {dimension_numbers = #tpu.dot_dimension_numbers<[1], [0], [0], [1], [0, 0, 1, 1], [], []>} : vector<8x128xf32>, vector<128x384xf32>, vector<8x384xf32> -> vector<8x384xf32>
    %16 = vector.broadcast %6 : vector<1x384xf32> to vector<8x384xf32>
    %17 = arith.addf %15, %16 : vector<8x384xf32>
    %18 = vector.extract_strided_slice %14 {offsets = [0, 0], sizes = [8, 128], strides = [1, 1]} : vector<8x384xf32> to vector<8x128xf32>
    %19 = vector.extract_strided_slice %17 {offsets = [0, 0], sizes = [8, 128], strides = [1, 1]} : vector<8x384xf32> to vector<8x128xf32>
    %20 = arith.addf %18, %19 : vector<8x128xf32>
    %21 = arith.negf %20 : vector<8x128xf32>
    %22 = math.exp %21 : vector<8x128xf32>
    %cst_12 = arith.constant 1.000000e+00 : f32
    %23 = vector.broadcast %cst_12 : f32 to vector<8x128xf32>
    %24 = arith.addf %23, %22 : vector<8x128xf32>
    %25 = arith.divf %23, %24 : vector<8x128xf32>
    %26 = vector.extract_strided_slice %14 {offsets = [0, 128], sizes = [8, 128], strides = [1, 1]} : vector<8x384xf32> to vector<8x128xf32>
    %27 = vector.extract_strided_slice %17 {offsets = [0, 128], sizes = [8, 128], strides = [1, 1]} : vector<8x384xf32> to vector<8x128xf32>
    %28 = arith.addf %26, %27 : vector<8x128xf32>
    %29 = arith.negf %28 : vector<8x128xf32>
    %30 = math.exp %29 : vector<8x128xf32>
    %cst_13 = arith.constant 1.000000e+00 : f32
    %31 = vector.broadcast %cst_13 : f32 to vector<8x128xf32>
    %32 = arith.addf %31, %30 : vector<8x128xf32>
    %33 = arith.divf %31, %32 : vector<8x128xf32>
    %34 = vector.extract_strided_slice %14 {offsets = [0, 256], sizes = [8, 128], strides = [1, 1]} : vector<8x384xf32> to vector<8x128xf32>
    %35 = vector.extract_strided_slice %17 {offsets = [0, 256], sizes = [8, 128], strides = [1, 1]} : vector<8x384xf32> to vector<8x128xf32>
    %36 = arith.mulf %25, %35 : vector<8x128xf32>
    %37 = arith.addf %34, %36 : vector<8x128xf32>
    %38 = math.tanh %37 : vector<8x128xf32>
    %cst_14 = arith.constant 1.000000e+00 : f32
    %39 = vector.broadcast %cst_14 : f32 to vector<8x128xf32>
    %40 = arith.subf %39, %33 : vector<8x128xf32>
    %41 = arith.mulf %40, %38 : vector<8x128xf32>
    %42 = arith.mulf %33, %7 : vector<8x128xf32>
    %43 = arith.addf %41, %42 : vector<8x128xf32>
    %c0_15 = arith.constant 0 : index
    %44 = arith.index_cast %11 : i32 to index
    %c0_16 = arith.constant 0 : index
    %c0_17 = arith.constant 0 : index
    %45 = vector.load %arg6[%c0_15, %44, %c0_16, %c0_17] : memref<1x8x8x128xf32, #tpu.memory_space<vmem>>, vector<1x1x8x128xf32>
    %46 = vector.shape_cast %45 : vector<1x1x8x128xf32> to vector<8x128xf32>
    %47 = vector.shape_cast %43 : vector<8x128xf32> to vector<1x1x8x128xf32>
    tpu.vector_store %arg6[%c0_15, %44, %c0_16, %c0_17], %47 {strides = array<i32>} : memref<1x8x8x128xf32, #tpu.memory_space<vmem>>, vector<1x1x8x128xf32>,
    %c1_i32 = arith.constant 1 : i32
    %c2_i32_18 = arith.constant 2 : i32
    %48 = arith.muli %c2_i32_18, %c1_i32 : i32
    %c7_i32_19 = arith.constant 7 : i32
    %49 = arith.subi %c7_i32_19, %48 : i32
    %50 = arith.muli %arg0, %49 : i32
    %51 = arith.addi %c1_i32, %50 : i32
    %c0_20 = arith.constant 0 : index
    %52 = arith.index_cast %51 : i32 to index
    %c0_21 = arith.constant 0 : index
    %c0_22 = arith.constant 0 : index
    %53 = vector.load %arg2[%c0_20, %52, %c0_21, %c0_22] : memref<1x8x8x384xf32, #tpu.memory_space<vmem>>, vector<1x1x8x384xf32>
    %54 = vector.shape_cast %53 : vector<1x1x8x384xf32> to vector<8x384xf32>
    %cst_23 = arith.constant dense<0.000000e+00> : vector<8x384xf32>
    %55 = tpu.matmul %43, %4, %cst_23 {dimension_numbers = #tpu.dot_dimension_numbers<[1], [0], [0], [1], [0, 0, 1, 1], [], []>} : vector<8x128xf32>, vector<128x384xf32>, vector<8x384xf32> -> vector<8x384xf32>
    %56 = vector.broadcast %6 : vector<1x384xf32> to vector<8x384xf32>
    %57 = arith.addf %55, %56 : vector<8x384xf32>
    %58 = vector.extract_strided_slice %54 {offsets = [0, 0], sizes = [8, 128], strides = [1, 1]} : vector<8x384xf32> to vector<8x128xf32>
    %59 = vector.extract_strided_slice %57 {offsets = [0, 0], sizes = [8, 128], strides = [1, 1]} : vector<8x384xf32> to vector<8x128xf32>
    %60 = arith.addf %58, %59 : vector<8x128xf32>
    %61 = arith.negf %60 : vector<8x128xf32>
    %62 = math.exp %61 : vector<8x128xf32>
    %cst_24 = arith.constant 1.000000e+00 : f32
    %63 = vector.broadcast %cst_24 : f32 to vector<8x128xf32>
    %64 = arith.addf %63, %62 : vector<8x128xf32>
    %65 = arith.divf %63, %64 : vector<8x128xf32>
    %66 = vector.extract_strided_slice %54 {offsets = [0, 128], sizes = [8, 128], strides = [1, 1]} : vector<8x384xf32> to vector<8x128xf32>
    %67 = vector.extract_strided_slice %57 {offsets = [0, 128], sizes = [8, 128], strides = [1, 1]} : vector<8x384xf32> to vector<8x128xf32>
    %68 = arith.addf %66, %67 : vector<8x128xf32>
    %69 = arith.negf %68 : vector<8x128xf32>
    %70 = math.exp %69 : vector<8x128xf32>
    %cst_25 = arith.constant 1.000000e+00 : f32
    %71 = vector.broadcast %cst_25 : f32 to vector<8x128xf32>
    %72 = arith.addf %71, %70 : vector<8x128xf32>
    %73 = arith.divf %71, %72 : vector<8x128xf32>
    %74 = vector.extract_strided_slice %54 {offsets = [0, 256], sizes = [8, 128], strides = [1, 1]} : vector<8x384xf32> to vector<8x128xf32>
    %75 = vector.extract_strided_slice %57 {offsets = [0, 256], sizes = [8, 128], strides = [1, 1]} : vector<8x384xf32> to vector<8x128xf32>
    %76 = arith.mulf %65, %75 : vector<8x128xf32>
    %77 = arith.addf %74, %76 : vector<8x128xf32>
    %78 = math.tanh %77 : vector<8x128xf32>
    %cst_26 = arith.constant 1.000000e+00 : f32
    %79 = vector.broadcast %cst_26 : f32 to vector<8x128xf32>
    %80 = arith.subf %79, %73 : vector<8x128xf32>
    %81 = arith.mulf %80, %78 : vector<8x128xf32>
    %82 = arith.mulf %73, %43 : vector<8x128xf32>
    %83 = arith.addf %81, %82 : vector<8x128xf32>
    %c0_27 = arith.constant 0 : index
    %84 = arith.index_cast %51 : i32 to index
    %c0_28 = arith.constant 0 : index
    %c0_29 = arith.constant 0 : index
    %85 = vector.load %arg6[%c0_27, %84, %c0_28, %c0_29] : memref<1x8x8x128xf32, #tpu.memory_space<vmem>>, vector<1x1x8x128xf32>
    %86 = vector.shape_cast %85 : vector<1x1x8x128xf32> to vector<8x128xf32>
    %87 = vector.shape_cast %83 : vector<8x128xf32> to vector<1x1x8x128xf32>
    tpu.vector_store %arg6[%c0_27, %84, %c0_28, %c0_29], %87 {strides = array<i32>} : memref<1x8x8x128xf32, #tpu.memory_space<vmem>>, vector<1x1x8x128xf32>,
    %c2_i32_30 = arith.constant 2 : i32
    %c2_i32_31 = arith.constant 2 : i32
    %88 = arith.muli %c2_i32_31, %c2_i32_30 : i32
    %c7_i32_32 = arith.constant 7 : i32
    %89 = arith.subi %c7_i32_32, %88 : i32
    %90 = arith.muli %arg0, %89 : i32
    %91 = arith.addi %c2_i32_30, %90 : i32
    %c0_33 = arith.constant 0 : index
    %92 = arith.index_cast %91 : i32 to index
    %c0_34 = arith.constant 0 : index
    %c0_35 = arith.constant 0 : index
    %93 = vector.load %arg2[%c0_33, %92, %c0_34, %c0_35] : memref<1x8x8x384xf32, #tpu.memory_space<vmem>>, vector<1x1x8x384xf32>
    %94 = vector.shape_cast %93 : vector<1x1x8x384xf32> to vector<8x384xf32>
    %cst_36 = arith.constant dense<0.000000e+00> : vector<8x384xf32>
    %95 = tpu.matmul %83, %4, %cst_36 {dimension_numbers = #tpu.dot_dimension_numbers<[1], [0], [0], [1], [0, 0, 1, 1], [], []>} : vector<8x128xf32>, vector<128x384xf32>, vector<8x384xf32> -> vector<8x384xf32>
    %96 = vector.broadcast %6 : vector<1x384xf32> to vector<8x384xf32>
    %97 = arith.addf %95, %96 : vector<8x384xf32>
    %98 = vector.extract_strided_slice %94 {offsets = [0, 0], sizes = [8, 128], strides = [1, 1]} : vector<8x384xf32> to vector<8x128xf32>
    %99 = vector.extract_strided_slice %97 {offsets = [0, 0], sizes = [8, 128], strides = [1, 1]} : vector<8x384xf32> to vector<8x128xf32>
    %100 = arith.addf %98, %99 : vector<8x128xf32>
    %101 = arith.negf %100 : vector<8x128xf32>
    %102 = math.exp %101 : vector<8x128xf32>
    %cst_37 = arith.constant 1.000000e+00 : f32
    %103 = vector.broadcast %cst_37 : f32 to vector<8x128xf32>
    %104 = arith.addf %103, %102 : vector<8x128xf32>
    %105 = arith.divf %103, %104 : vector<8x128xf32>
    %106 = vector.extract_strided_slice %94 {offsets = [0, 128], sizes = [8, 128], strides = [1, 1]} : vector<8x384xf32> to vector<8x128xf32>
    %107 = vector.extract_strided_slice %97 {offsets = [0, 128], sizes = [8, 128], strides = [1, 1]} : vector<8x384xf32> to vector<8x128xf32>
    %108 = arith.addf %106, %107 : vector<8x128xf32>
    %109 = arith.negf %108 : vector<8x128xf32>
    %110 = math.exp %109 : vector<8x128xf32>
    %cst_38 = arith.constant 1.000000e+00 : f32
    %111 = vector.broadcast %cst_38 : f32 to vector<8x128xf32>
    %112 = arith.addf %111, %110 : vector<8x128xf32>
    %113 = arith.divf %111, %112 : vector<8x128xf32>
    %114 = vector.extract_strided_slice %94 {offsets = [0, 256], sizes = [8, 128], strides = [1, 1]} : vector<8x384xf32> to vector<8x128xf32>
    %115 = vector.extract_strided_slice %97 {offsets = [0, 256], sizes = [8, 128], strides = [1, 1]} : vector<8x384xf32> to vector<8x128xf32>
    %116 = arith.mulf %105, %115 : vector<8x128xf32>
    %117 = arith.addf %114, %116 : vector<8x128xf32>
    %118 = math.tanh %117 : vector<8x128xf32>
    %cst_39 = arith.constant 1.000000e+00 : f32
    %119 = vector.broadcast %cst_39 : f32 to vector<8x128xf32>
    %120 = arith.subf %119, %113 : vector<8x128xf32>
    %121 = arith.mulf %120, %118 : vector<8x128xf32>
    %122 = arith.mulf %113, %83 : vector<8x128xf32>
    %123 = arith.addf %121, %122 : vector<8x128xf32>
    %c0_40 = arith.constant 0 : index
    %124 = arith.index_cast %91 : i32 to index
    %c0_41 = arith.constant 0 : index
    %c0_42 = arith.constant 0 : index
    %125 = vector.load %arg6[%c0_40, %124, %c0_41, %c0_42] : memref<1x8x8x128xf32, #tpu.memory_space<vmem>>, vector<1x1x8x128xf32>
    %126 = vector.shape_cast %125 : vector<1x1x8x128xf32> to vector<8x128xf32>
    %127 = vector.shape_cast %123 : vector<8x128xf32> to vector<1x1x8x128xf32>
    tpu.vector_store %arg6[%c0_40, %124, %c0_41, %c0_42], %127 {strides = array<i32>} : memref<1x8x8x128xf32, #tpu.memory_space<vmem>>, vector<1x1x8x128xf32>,
    %c3_i32 = arith.constant 3 : i32
    %c2_i32_43 = arith.constant 2 : i32
    %128 = arith.muli %c2_i32_43, %c3_i32 : i32
    %c7_i32_44 = arith.constant 7 : i32
    %129 = arith.subi %c7_i32_44, %128 : i32
    %130 = arith.muli %arg0, %129 : i32
    %131 = arith.addi %c3_i32, %130 : i32
    %c0_45 = arith.constant 0 : index
    %132 = arith.index_cast %131 : i32 to index
    %c0_46 = arith.constant 0 : index
    %c0_47 = arith.constant 0 : index
    %133 = vector.load %arg2[%c0_45, %132, %c0_46, %c0_47] : memref<1x8x8x384xf32, #tpu.memory_space<vmem>>, vector<1x1x8x384xf32>
    %134 = vector.shape_cast %133 : vector<1x1x8x384xf32> to vector<8x384xf32>
    %cst_48 = arith.constant dense<0.000000e+00> : vector<8x384xf32>
    %135 = tpu.matmul %123, %4, %cst_48 {dimension_numbers = #tpu.dot_dimension_numbers<[1], [0], [0], [1], [0, 0, 1, 1], [], []>} : vector<8x128xf32>, vector<128x384xf32>, vector<8x384xf32> -> vector<8x384xf32>
    %136 = vector.broadcast %6 : vector<1x384xf32> to vector<8x384xf32>
    %137 = arith.addf %135, %136 : vector<8x384xf32>
    %138 = vector.extract_strided_slice %134 {offsets = [0, 0], sizes = [8, 128], strides = [1, 1]} : vector<8x384xf32> to vector<8x128xf32>
    %139 = vector.extract_strided_slice %137 {offsets = [0, 0], sizes = [8, 128], strides = [1, 1]} : vector<8x384xf32> to vector<8x128xf32>
    %140 = arith.addf %138, %139 : vector<8x128xf32>
    %141 = arith.negf %140 : vector<8x128xf32>
    %142 = math.exp %141 : vector<8x128xf32>
    %cst_49 = arith.constant 1.000000e+00 : f32
    %143 = vector.broadcast %cst_49 : f32 to vector<8x128xf32>
    %144 = arith.addf %143, %142 : vector<8x128xf32>
    %145 = arith.divf %143, %144 : vector<8x128xf32>
    %146 = vector.extract_strided_slice %134 {offsets = [0, 128], sizes = [8, 128], strides = [1, 1]} : vector<8x384xf32> to vector<8x128xf32>
    %147 = vector.extract_strided_slice %137 {offsets = [0, 128], sizes = [8, 128], strides = [1, 1]} : vector<8x384xf32> to vector<8x128xf32>
    %148 = arith.addf %146, %147 : vector<8x128xf32>
    %149 = arith.negf %148 : vector<8x128xf32>
    %150 = math.exp %149 : vector<8x128xf32>
    %cst_50 = arith.constant 1.000000e+00 : f32
    %151 = vector.broadcast %cst_50 : f32 to vector<8x128xf32>
    %152 = arith.addf %151, %150 : vector<8x128xf32>
    %153 = arith.divf %151, %152 : vector<8x128xf32>
    %154 = vector.extract_strided_slice %134 {offsets = [0, 256], sizes = [8, 128], strides = [1, 1]} : vector<8x384xf32> to vector<8x128xf32>
    %155 = vector.extract_strided_slice %137 {offsets = [0, 256], sizes = [8, 128], strides = [1, 1]} : vector<8x384xf32> to vector<8x128xf32>
    %156 = arith.mulf %145, %155 : vector<8x128xf32>
    %157 = arith.addf %154, %156 : vector<8x128xf32>
    %158 = math.tanh %157 : vector<8x128xf32>
    %cst_51 = arith.constant 1.000000e+00 : f32
    %159 = vector.broadcast %cst_51 : f32 to vector<8x128xf32>
    %160 = arith.subf %159, %153 : vector<8x128xf32>
    %161 = arith.mulf %160, %158 : vector<8x128xf32>
    %162 = arith.mulf %153, %123 : vector<8x128xf32>
    %163 = arith.addf %161, %162 : vector<8x128xf32>
    %c0_52 = arith.constant 0 : index
    %164 = arith.index_cast %131 : i32 to index
    %c0_53 = arith.constant 0 : index
    %c0_54 = arith.constant 0 : index
    %165 = vector.load %arg6[%c0_52, %164, %c0_53, %c0_54] : memref<1x8x8x128xf32, #tpu.memory_space<vmem>>, vector<1x1x8x128xf32>
    %166 = vector.shape_cast %165 : vector<1x1x8x128xf32> to vector<8x128xf32>
    %167 = vector.shape_cast %163 : vector<8x128xf32> to vector<1x1x8x128xf32>
    tpu.vector_store %arg6[%c0_52, %164, %c0_53, %c0_54], %167 {strides = array<i32>} : memref<1x8x8x128xf32, #tpu.memory_space<vmem>>, vector<1x1x8x128xf32>,
    %c4_i32 = arith.constant 4 : i32
    %c2_i32_55 = arith.constant 2 : i32
    %168 = arith.muli %c2_i32_55, %c4_i32 : i32
    %c7_i32_56 = arith.constant 7 : i32
    %169 = arith.subi %c7_i32_56, %168 : i32
    %170 = arith.muli %arg0, %169 : i32
    %171 = arith.addi %c4_i32, %170 : i32
    %c0_57 = arith.constant 0 : index
    %172 = arith.index_cast %171 : i32 to index
    %c0_58 = arith.constant 0 : index
    %c0_59 = arith.constant 0 : index
    %173 = vector.load %arg2[%c0_57, %172, %c0_58, %c0_59] : memref<1x8x8x384xf32, #tpu.memory_space<vmem>>, vector<1x1x8x384xf32>
    %174 = vector.shape_cast %173 : vector<1x1x8x384xf32> to vector<8x384xf32>
    %cst_60 = arith.constant dense<0.000000e+00> : vector<8x384xf32>
    %175 = tpu.matmul %163, %4, %cst_60 {dimension_numbers = #tpu.dot_dimension_numbers<[1], [0], [0], [1], [0, 0, 1, 1], [], []>} : vector<8x128xf32>, vector<128x384xf32>, vector<8x384xf32> -> vector<8x384xf32>
    %176 = vector.broadcast %6 : vector<1x384xf32> to vector<8x384xf32>
    %177 = arith.addf %175, %176 : vector<8x384xf32>
    %178 = vector.extract_strided_slice %174 {offsets = [0, 0], sizes = [8, 128], strides = [1, 1]} : vector<8x384xf32> to vector<8x128xf32>
    %179 = vector.extract_strided_slice %177 {offsets = [0, 0], sizes = [8, 128], strides = [1, 1]} : vector<8x384xf32> to vector<8x128xf32>
    %180 = arith.addf %178, %179 : vector<8x128xf32>
    %181 = arith.negf %180 : vector<8x128xf32>
    %182 = math.exp %181 : vector<8x128xf32>
    %cst_61 = arith.constant 1.000000e+00 : f32
    %183 = vector.broadcast %cst_61 : f32 to vector<8x128xf32>
    %184 = arith.addf %183, %182 : vector<8x128xf32>
    %185 = arith.divf %183, %184 : vector<8x128xf32>
    %186 = vector.extract_strided_slice %174 {offsets = [0, 128], sizes = [8, 128], strides = [1, 1]} : vector<8x384xf32> to vector<8x128xf32>
    %187 = vector.extract_strided_slice %177 {offsets = [0, 128], sizes = [8, 128], strides = [1, 1]} : vector<8x384xf32> to vector<8x128xf32>
    %188 = arith.addf %186, %187 : vector<8x128xf32>
    %189 = arith.negf %188 : vector<8x128xf32>
    %190 = math.exp %189 : vector<8x128xf32>
    %cst_62 = arith.constant 1.000000e+00 : f32
    %191 = vector.broadcast %cst_62 : f32 to vector<8x128xf32>
    %192 = arith.addf %191, %190 : vector<8x128xf32>
    %193 = arith.divf %191, %192 : vector<8x128xf32>
    %194 = vector.extract_strided_slice %174 {offsets = [0, 256], sizes = [8, 128], strides = [1, 1]} : vector<8x384xf32> to vector<8x128xf32>
    %195 = vector.extract_strided_slice %177 {offsets = [0, 256], sizes = [8, 128], strides = [1, 1]} : vector<8x384xf32> to vector<8x128xf32>
    %196 = arith.mulf %185, %195 : vector<8x128xf32>
    %197 = arith.addf %194, %196 : vector<8x128xf32>
    %198 = math.tanh %197 : vector<8x128xf32>
    %cst_63 = arith.constant 1.000000e+00 : f32
    %199 = vector.broadcast %cst_63 : f32 to vector<8x128xf32>
    %200 = arith.subf %199, %193 : vector<8x128xf32>
    %201 = arith.mulf %200, %198 : vector<8x128xf32>
    %202 = arith.mulf %193, %163 : vector<8x128xf32>
    %203 = arith.addf %201, %202 : vector<8x128xf32>
    %c0_64 = arith.constant 0 : index
    %204 = arith.index_cast %171 : i32 to index
    %c0_65 = arith.constant 0 : index
    %c0_66 = arith.constant 0 : index
    %205 = vector.load %arg6[%c0_64, %204, %c0_65, %c0_66] : memref<1x8x8x128xf32, #tpu.memory_space<vmem>>, vector<1x1x8x128xf32>
    %206 = vector.shape_cast %205 : vector<1x1x8x128xf32> to vector<8x128xf32>
    %207 = vector.shape_cast %203 : vector<8x128xf32> to vector<1x1x8x128xf32>
    tpu.vector_store %arg6[%c0_64, %204, %c0_65, %c0_66], %207 {strides = array<i32>} : memref<1x8x8x128xf32, #tpu.memory_space<vmem>>, vector<1x1x8x128xf32>,
    %c5_i32 = arith.constant 5 : i32
    %c2_i32_67 = arith.constant 2 : i32
    %208 = arith.muli %c2_i32_67, %c5_i32 : i32
    %c7_i32_68 = arith.constant 7 : i32
    %209 = arith.subi %c7_i32_68, %208 : i32
    %210 = arith.muli %arg0, %209 : i32
    %211 = arith.addi %c5_i32, %210 : i32
    %c0_69 = arith.constant 0 : index
    %212 = arith.index_cast %211 : i32 to index
    %c0_70 = arith.constant 0 : index
    %c0_71 = arith.constant 0 : index
    %213 = vector.load %arg2[%c0_69, %212, %c0_70, %c0_71] : memref<1x8x8x384xf32, #tpu.memory_space<vmem>>, vector<1x1x8x384xf32>
    %214 = vector.shape_cast %213 : vector<1x1x8x384xf32> to vector<8x384xf32>
    %cst_72 = arith.constant dense<0.000000e+00> : vector<8x384xf32>
    %215 = tpu.matmul %203, %4, %cst_72 {dimension_numbers = #tpu.dot_dimension_numbers<[1], [0], [0], [1], [0, 0, 1, 1], [], []>} : vector<8x128xf32>, vector<128x384xf32>, vector<8x384xf32> -> vector<8x384xf32>
    %216 = vector.broadcast %6 : vector<1x384xf32> to vector<8x384xf32>
    %217 = arith.addf %215, %216 : vector<8x384xf32>
    %218 = vector.extract_strided_slice %214 {offsets = [0, 0], sizes = [8, 128], strides = [1, 1]} : vector<8x384xf32> to vector<8x128xf32>
    %219 = vector.extract_strided_slice %217 {offsets = [0, 0], sizes = [8, 128], strides = [1, 1]} : vector<8x384xf32> to vector<8x128xf32>
    %220 = arith.addf %218, %219 : vector<8x128xf32>
    %221 = arith.negf %220 : vector<8x128xf32>
    %222 = math.exp %221 : vector<8x128xf32>
    %cst_73 = arith.constant 1.000000e+00 : f32
    %223 = vector.broadcast %cst_73 : f32 to vector<8x128xf32>
    %224 = arith.addf %223, %222 : vector<8x128xf32>
    %225 = arith.divf %223, %224 : vector<8x128xf32>
    %226 = vector.extract_strided_slice %214 {offsets = [0, 128], sizes = [8, 128], strides = [1, 1]} : vector<8x384xf32> to vector<8x128xf32>
    %227 = vector.extract_strided_slice %217 {offsets = [0, 128], sizes = [8, 128], strides = [1, 1]} : vector<8x384xf32> to vector<8x128xf32>
    %228 = arith.addf %226, %227 : vector<8x128xf32>
    %229 = arith.negf %228 : vector<8x128xf32>
    %230 = math.exp %229 : vector<8x128xf32>
    %cst_74 = arith.constant 1.000000e+00 : f32
    %231 = vector.broadcast %cst_74 : f32 to vector<8x128xf32>
    %232 = arith.addf %231, %230 : vector<8x128xf32>
    %233 = arith.divf %231, %232 : vector<8x128xf32>
    %234 = vector.extract_strided_slice %214 {offsets = [0, 256], sizes = [8, 128], strides = [1, 1]} : vector<8x384xf32> to vector<8x128xf32>
    %235 = vector.extract_strided_slice %217 {offsets = [0, 256], sizes = [8, 128], strides = [1, 1]} : vector<8x384xf32> to vector<8x128xf32>
    %236 = arith.mulf %225, %235 : vector<8x128xf32>
    %237 = arith.addf %234, %236 : vector<8x128xf32>
    %238 = math.tanh %237 : vector<8x128xf32>
    %cst_75 = arith.constant 1.000000e+00 : f32
    %239 = vector.broadcast %cst_75 : f32 to vector<8x128xf32>
    %240 = arith.subf %239, %233 : vector<8x128xf32>
    %241 = arith.mulf %240, %238 : vector<8x128xf32>
    %242 = arith.mulf %233, %203 : vector<8x128xf32>
    %243 = arith.addf %241, %242 : vector<8x128xf32>
    %c0_76 = arith.constant 0 : index
    %244 = arith.index_cast %211 : i32 to index
    %c0_77 = arith.constant 0 : index
    %c0_78 = arith.constant 0 : index
    %245 = vector.load %arg6[%c0_76, %244, %c0_77, %c0_78] : memref<1x8x8x128xf32, #tpu.memory_space<vmem>>, vector<1x1x8x128xf32>
    %246 = vector.shape_cast %245 : vector<1x1x8x128xf32> to vector<8x128xf32>
    %247 = vector.shape_cast %243 : vector<8x128xf32> to vector<1x1x8x128xf32>
    tpu.vector_store %arg6[%c0_76, %244, %c0_77, %c0_78], %247 {strides = array<i32>} : memref<1x8x8x128xf32, #tpu.memory_space<vmem>>, vector<1x1x8x128xf32>,
    %c6_i32 = arith.constant 6 : i32
    %c2_i32_79 = arith.constant 2 : i32
    %248 = arith.muli %c2_i32_79, %c6_i32 : i32
    %c7_i32_80 = arith.constant 7 : i32
    %249 = arith.subi %c7_i32_80, %248 : i32
    %250 = arith.muli %arg0, %249 : i32
    %251 = arith.addi %c6_i32, %250 : i32
    %c0_81 = arith.constant 0 : index
    %252 = arith.index_cast %251 : i32 to index
    %c0_82 = arith.constant 0 : index
    %c0_83 = arith.constant 0 : index
    %253 = vector.load %arg2[%c0_81, %252, %c0_82, %c0_83] : memref<1x8x8x384xf32, #tpu.memory_space<vmem>>, vector<1x1x8x384xf32>
    %254 = vector.shape_cast %253 : vector<1x1x8x384xf32> to vector<8x384xf32>
    %cst_84 = arith.constant dense<0.000000e+00> : vector<8x384xf32>
    %255 = tpu.matmul %243, %4, %cst_84 {dimension_numbers = #tpu.dot_dimension_numbers<[1], [0], [0], [1], [0, 0, 1, 1], [], []>} : vector<8x128xf32>, vector<128x384xf32>, vector<8x384xf32> -> vector<8x384xf32>
    %256 = vector.broadcast %6 : vector<1x384xf32> to vector<8x384xf32>
    %257 = arith.addf %255, %256 : vector<8x384xf32>
    %258 = vector.extract_strided_slice %254 {offsets = [0, 0], sizes = [8, 128], strides = [1, 1]} : vector<8x384xf32> to vector<8x128xf32>
    %259 = vector.extract_strided_slice %257 {offsets = [0, 0], sizes = [8, 128], strides = [1, 1]} : vector<8x384xf32> to vector<8x128xf32>
    %260 = arith.addf %258, %259 : vector<8x128xf32>
    %261 = arith.negf %260 : vector<8x128xf32>
    %262 = math.exp %261 : vector<8x128xf32>
    %cst_85 = arith.constant 1.000000e+00 : f32
    %263 = vector.broadcast %cst_85 : f32 to vector<8x128xf32>
    %264 = arith.addf %263, %262 : vector<8x128xf32>
    %265 = arith.divf %263, %264 : vector<8x128xf32>
    %266 = vector.extract_strided_slice %254 {offsets = [0, 128], sizes = [8, 128], strides = [1, 1]} : vector<8x384xf32> to vector<8x128xf32>
    %267 = vector.extract_strided_slice %257 {offsets = [0, 128], sizes = [8, 128], strides = [1, 1]} : vector<8x384xf32> to vector<8x128xf32>
    %268 = arith.addf %266, %267 : vector<8x128xf32>
    %269 = arith.negf %268 : vector<8x128xf32>
    %270 = math.exp %269 : vector<8x128xf32>
    %cst_86 = arith.constant 1.000000e+00 : f32
    %271 = vector.broadcast %cst_86 : f32 to vector<8x128xf32>
    %272 = arith.addf %271, %270 : vector<8x128xf32>
    %273 = arith.divf %271, %272 : vector<8x128xf32>
    %274 = vector.extract_strided_slice %254 {offsets = [0, 256], sizes = [8, 128], strides = [1, 1]} : vector<8x384xf32> to vector<8x128xf32>
    %275 = vector.extract_strided_slice %257 {offsets = [0, 256], sizes = [8, 128], strides = [1, 1]} : vector<8x384xf32> to vector<8x128xf32>
    %276 = arith.mulf %265, %275 : vector<8x128xf32>
    %277 = arith.addf %274, %276 : vector<8x128xf32>
    %278 = math.tanh %277 : vector<8x128xf32>
    %cst_87 = arith.constant 1.000000e+00 : f32
    %279 = vector.broadcast %cst_87 : f32 to vector<8x128xf32>
    %280 = arith.subf %279, %273 : vector<8x128xf32>
    %281 = arith.mulf %280, %278 : vector<8x128xf32>
    %282 = arith.mulf %273, %243 : vector<8x128xf32>
    %283 = arith.addf %281, %282 : vector<8x128xf32>
    %c0_88 = arith.constant 0 : index
    %284 = arith.index_cast %251 : i32 to index
    %c0_89 = arith.constant 0 : index
    %c0_90 = arith.constant 0 : index
    %285 = vector.load %arg6[%c0_88, %284, %c0_89, %c0_90] : memref<1x8x8x128xf32, #tpu.memory_space<vmem>>, vector<1x1x8x128xf32>
    %286 = vector.shape_cast %285 : vector<1x1x8x128xf32> to vector<8x128xf32>
    %287 = vector.shape_cast %283 : vector<8x128xf32> to vector<1x1x8x128xf32>
    tpu.vector_store %arg6[%c0_88, %284, %c0_89, %c0_90], %287 {strides = array<i32>} : memref<1x8x8x128xf32, #tpu.memory_space<vmem>>, vector<1x1x8x128xf32>,
    %c7_i32_91 = arith.constant 7 : i32
    %c2_i32_92 = arith.constant 2 : i32
    %288 = arith.muli %c2_i32_92, %c7_i32_91 : i32
    %c7_i32_93 = arith.constant 7 : i32
    %289 = arith.subi %c7_i32_93, %288 : i32
    %290 = arith.muli %arg0, %289 : i32
    %291 = arith.addi %c7_i32_91, %290 : i32
    %c0_94 = arith.constant 0 : index
    %292 = arith.index_cast %291 : i32 to index
    %c0_95 = arith.constant 0 : index
    %c0_96 = arith.constant 0 : index
    %293 = vector.load %arg2[%c0_94, %292, %c0_95, %c0_96] : memref<1x8x8x384xf32, #tpu.memory_space<vmem>>, vector<1x1x8x384xf32>
    %294 = vector.shape_cast %293 : vector<1x1x8x384xf32> to vector<8x384xf32>
    %cst_97 = arith.constant dense<0.000000e+00> : vector<8x384xf32>
    %295 = tpu.matmul %283, %4, %cst_97 {dimension_numbers = #tpu.dot_dimension_numbers<[1], [0], [0], [1], [0, 0, 1, 1], [], []>} : vector<8x128xf32>, vector<128x384xf32>, vector<8x384xf32> -> vector<8x384xf32>
    %296 = vector.broadcast %6 : vector<1x384xf32> to vector<8x384xf32>
    %297 = arith.addf %295, %296 : vector<8x384xf32>
    %298 = vector.extract_strided_slice %294 {offsets = [0, 0], sizes = [8, 128], strides = [1, 1]} : vector<8x384xf32> to vector<8x128xf32>
    %299 = vector.extract_strided_slice %297 {offsets = [0, 0], sizes = [8, 128], strides = [1, 1]} : vector<8x384xf32> to vector<8x128xf32>
    %300 = arith.addf %298, %299 : vector<8x128xf32>
    %301 = arith.negf %300 : vector<8x128xf32>
    %302 = math.exp %301 : vector<8x128xf32>
    %cst_98 = arith.constant 1.000000e+00 : f32
    %303 = vector.broadcast %cst_98 : f32 to vector<8x128xf32>
    %304 = arith.addf %303, %302 : vector<8x128xf32>
    %305 = arith.divf %303, %304 : vector<8x128xf32>
    %306 = vector.extract_strided_slice %294 {offsets = [0, 128], sizes = [8, 128], strides = [1, 1]} : vector<8x384xf32> to vector<8x128xf32>
    %307 = vector.extract_strided_slice %297 {offsets = [0, 128], sizes = [8, 128], strides = [1, 1]} : vector<8x384xf32> to vector<8x128xf32>
    %308 = arith.addf %306, %307 : vector<8x128xf32>
    %309 = arith.negf %308 : vector<8x128xf32>
    %310 = math.exp %309 : vector<8x128xf32>
    %cst_99 = arith.constant 1.000000e+00 : f32
    %311 = vector.broadcast %cst_99 : f32 to vector<8x128xf32>
    %312 = arith.addf %311, %310 : vector<8x128xf32>
    %313 = arith.divf %311, %312 : vector<8x128xf32>
    %314 = vector.extract_strided_slice %294 {offsets = [0, 256], sizes = [8, 128], strides = [1, 1]} : vector<8x384xf32> to vector<8x128xf32>
    %315 = vector.extract_strided_slice %297 {offsets = [0, 256], sizes = [8, 128], strides = [1, 1]} : vector<8x384xf32> to vector<8x128xf32>
    %316 = arith.mulf %305, %315 : vector<8x128xf32>
    %317 = arith.addf %314, %316 : vector<8x128xf32>
    %318 = math.tanh %317 : vector<8x128xf32>
    %cst_100 = arith.constant 1.000000e+00 : f32
    %319 = vector.broadcast %cst_100 : f32 to vector<8x128xf32>
    %320 = arith.subf %319, %313 : vector<8x128xf32>
    %321 = arith.mulf %320, %318 : vector<8x128xf32>
    %322 = arith.mulf %313, %283 : vector<8x128xf32>
    %323 = arith.addf %321, %322 : vector<8x128xf32>
    %c0_101 = arith.constant 0 : index
    %324 = arith.index_cast %291 : i32 to index
    %c0_102 = arith.constant 0 : index
    %c0_103 = arith.constant 0 : index
    %325 = vector.load %arg6[%c0_101, %324, %c0_102, %c0_103] : memref<1x8x8x128xf32, #tpu.memory_space<vmem>>, vector<1x1x8x128xf32>
    %326 = vector.shape_cast %325 : vector<1x1x8x128xf32> to vector<8x128xf32>
    %327 = vector.shape_cast %323 : vector<8x128xf32> to vector<1x1x8x128xf32>
    tpu.vector_store %arg6[%c0_101, %324, %c0_102, %c0_103], %327 {strides = array<i32>} : memref<1x8x8x128xf32, #tpu.memory_space<vmem>>, vector<1x1x8x128xf32>,
    %c8_i32 = arith.constant 8 : i32
    %c0_104 = arith.constant 0 : index
    %c0_105 = arith.constant 0 : index
    %328 = vector.load %arg8[%c0_104, %c0_105] : memref<8x128xf32, #tpu.memory_space<vmem>>, vector<8x128xf32>
    tpu.vector_store %arg8[%c0_104, %c0_105], %323 {strides = array<i32>} : memref<8x128xf32, #tpu.memory_space<vmem>>, vector<8x128xf32>,
    %c0_i32_106 = arith.constant 0 : i32
    %329 = arith.cmpi eq, %arg1, %c0_i32_106 : i32
    %330 = arith.extui %329 : i1 to i32
    %c0_i32_107 = arith.constant 0 : i32
    %331 = arith.cmpi ne, %330, %c0_i32_107 : i32
    scf.if %331 {
      %c0_108 = arith.constant 0 : index
      %c0_109 = arith.constant 0 : index
      %c0_110 = arith.constant 0 : index
      %332 = vector.load %arg7[%c0_108, %c0_109, %c0_110] : memref<1x8x128xf32, #tpu.memory_space<vmem>>, vector<1x8x128xf32>
      %333 = vector.shape_cast %332 : vector<1x8x128xf32> to vector<8x128xf32>
      %334 = vector.shape_cast %323 : vector<8x128xf32> to vector<1x8x128xf32>
      tpu.vector_store %arg7[%c0_108, %c0_109, %c0_110], %334 {strides = array<i32>} : memref<1x8x128xf32, #tpu.memory_space<vmem>>, vector<1x8x128xf32>,
    } else {
    }
    return
  }
  func.func @transform_0(%arg0: i32, %arg1: i32) -> (i32, i32, i32, i32) {
    %c2_i32 = arith.constant 2 : i32
    %0 = arith.muli %c2_i32, %arg1 : i32
    %c0_i32 = arith.constant 0 : i32
    %1 = arith.subi %c0_i32, %0 : i32
    %2 = arith.muli %arg0, %1 : i32
    %3 = arith.addi %arg1, %2 : i32
    %c0_i32_0 = arith.constant 0 : i32
    %c0_i32_1 = arith.constant 0 : i32
    %c0_i32_2 = arith.constant 0 : i32
    return %arg0, %3, %c0_i32_0, %c0_i32_1 : i32, i32, i32, i32
  }
  func.func @transform_1(%arg0: i32, %arg1: i32) -> (i32, i32, i32) {
    %c0_i32 = arith.constant 0 : i32
    %c0_i32_0 = arith.constant 0 : i32
    %c0_i32_1 = arith.constant 0 : i32
    return %arg0, %c0_i32, %c0_i32_0 : i32, i32, i32
  }
  func.func @transform_2(%arg0: i32, %arg1: i32) -> (i32, i32, i32) {
    %c0_i32 = arith.constant 0 : i32
    %c0_i32_0 = arith.constant 0 : i32
    %c0_i32_1 = arith.constant 0 : i32
    return %arg0, %c0_i32, %c0_i32_0 : i32, i32, i32
  }
  func.func @transform_3(%arg0: i32, %arg1: i32) -> (i32, i32, i32) {
    %c0_i32 = arith.constant 0 : i32
    %c0_i32_0 = arith.constant 0 : i32
    %c0_i32_1 = arith.constant 0 : i32
    return %arg0, %c0_i32, %c0_i32_0 : i32, i32, i32
  }
  func.func @transform_4(%arg0: i32, %arg1: i32) -> (i32, i32, i32, i32) {
    %c2_i32 = arith.constant 2 : i32
    %0 = arith.muli %c2_i32, %arg1 : i32
    %c0_i32 = arith.constant 0 : i32
    %1 = arith.subi %c0_i32, %0 : i32
    %2 = arith.muli %arg0, %1 : i32
    %3 = arith.addi %arg1, %2 : i32
    %c0_i32_0 = arith.constant 0 : i32
    %c0_i32_1 = arith.constant 0 : i32
    %c0_i32_2 = arith.constant 0 : i32
    return %arg0, %3, %c0_i32_0, %c0_i32_1 : i32, i32, i32, i32
  }
  func.func @transform_5(%arg0: i32, %arg1: i32) -> (i32, i32, i32) {
    %c0_i32 = arith.constant 0 : i32
    %c0_i32_0 = arith.constant 0 : i32
    %c0_i32_1 = arith.constant 0 : i32
    return %arg0, %c0_i32, %c0_i32_0 : i32, i32, i32
  }
}

</mosaic_0001>

<bundles_post_ra>
// kernel: tpu_custom_call.1
= control target key start
LH: loop header
LB: loop body
LE: loop exit
PB: predicated region body
PF: predicated region fallthrough
CT: control target
= control target key end

     0   :  { %s4286_s0 = inlined_call_operand.hbm [shape: f32[2,8,8,384], index: 0, kind: input, shape index: {}]   ;;  %s4287_s1 = inlined_call_operand.hbm [shape: f32[2,8,128], index: 1, kind: input, shape index: {}]   ;;  %s4288_s2 = inlined_call_operand.hbm [shape: f32[2,128,384], index: 2, kind: input, shape index: {}]   ;;  %s4289_s3 = inlined_call_operand.vmem [shape: f32[2,1,384], index: 3, kind: input, shape index: {}]   ;;  %s4290_s4 = inlined_call_operand.hbm [shape: f32[2,8,8,128], index: 4, kind: output, shape index: {0}]   ;;  %s4291_s5 = inlined_call_operand.hbm [shape: f32[2,8,128], index: 5, kind: output, shape index: {1}]  }
   0x1   :  { %4296 = sst [smem:[#allocation19_spill]] %s4286_s0 }
   0x2   :  { %4297 = sst [smem:[#allocation20_spill]] %s4287_s1 }
   0x3   :  { %11 = vsyncpa [#allocation4], 0 }
   0x4   :  { %13 = vsyncpa [#allocation4 + $0x1], 0 }
   0x5   :  { %14 = vsyncpa [#allocation7], 0 }
   0x6   :  { %16 = vsyncpa [#allocation7 + $0x1], 0 }
   0x7   :  { %17 = vsyncpa [#allocation5], 0 }
   0x8   :  { %19 = vsyncpa [#allocation5 + $0x1], 0 }
   0x9   :  { %20 = vsyncpa [#allocation11], 0 }
   0xa   :  { %22 = vsyncpa [#allocation11 + $0x1], 0  ;;  %s3485_s18 = smov 0   ;;  %s3487_s19 = smov 0  }
   0xb   :  { %s3489_s20 = smov 0   ;;  %s3491_s21 = smov 0  }
   0xc   :  { %s3493_s22 = smov 0   ;;  %s3495_s23 = smov 0  }
   0xd LB: > { %4298 = sst [smem:[#allocation16_spill]] %s3429_s20  ;;  %s3516_s24 = sadd.s32 4294967295, %s3441_s23   ;;  %s3441_s23 = sphi %s3495_s23, %s28_s23   ;;  %s3437_s22 = sphi %s3493_s22, %s4323_s22   ;;  %s3433_s21 = sphi %s3491_s21, %s4322_s21   ;;  %s3429_s20 = sphi %s3489_s20, %s4318_s20   ;;  %s3425_s19 = sphi %s3487_s19, %s4321_s19   ;;  %s3421_s18 = sphi %s3485_s18, %s4320_s18  }
   0xe   : > { %s2121_s25 = sadd.s32 4294967294, %s3441_s23   ;;  %s40_s26 = sadd.s32 1, %s3437_s22 }
   0xf   : > { %s57_s27 = sadd.s32 1, %s3429_s20  ;;  %p42_p0 = scmp.ge.s32.totalorder %s40_s26, 2 }
  0x10   : > { %p64_p1 = scmp.ne.s32.totalorder %s3429_s20, %s3425_s19  ;;  %p65_p2 = scmp.eq.s32.totalorder %s3441_s23, 0 }
  0x11   : > { %p70_p3 = scmp.ne.s32.totalorder %s3425_s19, %s3421_s18  ;;  %s4325_s26 = smov (%p42_p0, %s40_s26), 0 }
  0x12   : > { %4299 = sst [smem:[#allocation17_spill]] %s4325_s26  ;;  %p3528_p4 = por %p65_p2, %p64_p1 }
  0x13   : > { %p71_p5 = scmp.eq.s32.totalorder %s3516_s24, 0  ;;  %s52_s29 = ssub.s32 %s3437_s22, %s4325_s26 }
  0x14   : > { %p182_p6 = scmp.eq.s32.totalorder %s3516_s24, 1  ;;  %p55_p7 = scmp.eq.s32.totalorder %s52_s29, 0 }
  0x15   : > { %p3536_p8 = por %p71_p5, %p70_p3  ;;  %p188_p10 = scmp.eq.s32.totalorder %s2121_s25, 1 }
  0x16   : > { %p3540_p9 = por %p182_p6, %p64_p1  ;;  %p3096_p13 = scmp.lt.s32.totalorder %s3441_s23, 2 }
  0x17   : > { %s4301_s30 = scalar_select %p3536_p8, 1, 0 }
  0x18   : > { %s4302_s6 = scalar_select %p3540_p9, 1, 0 }
  0x19   : > { %s3545_s7 = scalar_select %p55_p7, %s3429_s20, %s57_s27  }
  0x1a   : > { %p3547_p11 = por %p188_p10, %p70_p3  ;;  %s3554_s9 = sand.u32 1, %s3429_s20  }
  0x1b   : > { %4303 = sst [smem:[#allocation18_spill]] %s3545_s7  ;;  %s262_s10 = sand.u32 1, %s3441_s23  }
  0x1c   : > { %s4304_s8 = scalar_select %p3547_p11, 1, 0 }
  0x1d   : > { %s2125_s11 = sshll.u32 %s3554_s9, 3  ;;  %p3560_p0 = pnand %p3096_p13, %p3528_p4 }
  0x1e   : > { %s2126_s13 = sshll.u32 %s3437_s22, 7  ;;  %s4306_s1 = sld [smem:[#allocation20_spill]] }
  0x1f   : > { %s266_s17 = scalar_lea.vmem [#allocation6], %s2125_s11  ;;  %s3574_s28 = scalar_lea.sflag [#allocation7], %s262_s10 }
  0x20   : > { %s273_s25 = sshll.u32 %s266_s17, 4  ;;  %p3580_p3 = pneg %p3560_p0  ;;  %s3571_s25 = int_to_ptr.vmem [resolvable:$true] %s273_s25 }
  0x24   : > { %s3568_s16 = scalar_lea.hbm %s4306_s1, %s2126_s13  ;;  %s3238_s14 = scalar_lea.hbm %s4306_s1, 256 }
  0x25   : > { %s3233_s29 = scalar_lea.hbm %s3568_s16, 128  ;;  %p3239_p6 = scmp.lt.u32.totalorder %s3568_s16, %s4306_s1 }
  0x26   : > { %p3234_p2 = scmp.ne.s32.totalorder %s3568_s16, %s3233_s29  ;;  %p3240_p7 = scmp.lt.u32.totalorder %s3238_s14, %s3233_s29 }
  0x27   : > { %p3242_p13 = scmp.lt.u32.totalorder %s3233_s29, %s3568_s16 }
  0x28   : > { %p3236_p4 = pnand %p3580_p3, %p3234_p2  ;;  %p3241_p10 = por %p3240_p7, %p3239_p6 }
  0x2a   : > { %p3237_p5 = pneg %p3236_p4  ;;  %p3243_p12 = por %p3242_p13, %p3241_p10 }
  0x2c   : > { %p3244_p1 = pnand %p3243_p12, %p3237_p5 }
  0x2e   : > { %3247 = shalt.err (!%p3244_p1)
}
  0x2f   : > { %s3248_s10 = scalar_lea.vmem %s3571_s25, 128  ;;  %s3443_s13 = smov [#allocation6]  }
  0x30   : > { %p3249_p2 = scmp.ne.s32.totalorder %s3571_s25, %s3248_s10  ;;  %s3253_s11 = sshll.u32 %s3443_s13, 4  ;;  %s3254_s11 = int_to_ptr.vmem [resolvable:$false] %s3253_s11 }
  0x31   : > { %s3255_s15 = scalar_lea.vmem %s3254_s11, 256  ;;  %p3256_p9 = scmp.lt.s32.totalorder %s3571_s25, %s3254_s11 }
  0x32   : > { %p3251_p4 = pnand %p3249_p2, %p3580_p3  ;;  %p3257_p8 = scmp.lt.s32.totalorder %s3255_s15, %s3248_s10 }
  0x34   : > { %p3252_p11 = pneg %p3251_p4  ;;  %p3258_p6 = por %p3257_p8, %p3256_p9 }
  0x36   : > { %p3259_p7 = pnand %p3258_p6, %p3252_p11 }
  0x38   : > { %3262 = shalt.err (!%p3259_p7)
}
  0x39   : > { %3085 = dma.hbm_to_vmem [thread:$0]  (!%p3560_p0), %s3568_s16, 128, %s3571_s25, %s3574_s28  }
  0x3a   : > { %p306_p12 = scmp.lt.s32.totalorder %s3441_s23, 3  ;;  %p4308_p1 = scmp.ge.s32.totalorder %s3441_s23, 1 }
  0x3b   : > { %s3062_s14 = smul.u32 192, %s3554_s9  ;;  %s4310_s0 = sld [smem:[#allocation19_spill]] }
  0x3c   : > { %p3607_p5 = pnand %p4308_p1, %p306_p12  ;;  %s3063_s17 = smul.u32 3072, %s3437_s22 }
  0x3d   : > { %s238_s15 = scalar_lea.vmem [#allocation3], %s3062_s14  ;;  %s235_s16 = scalar_lea.sflag [#allocation4], %s3554_s9 }
  0x3e   : > { %s4309_s29 = scalar_select %p3607_p5, 1, 0 }
  0x3f   : > { %s252_s27 = sshll.u32 %s238_s15, 4  ;;  %s3618_s27 = int_to_ptr.vmem [resolvable:$true] %s252_s27 }
  0x41   : > { %s3616_s11 = scalar_lea.hbm %s4310_s0, %s3063_s17  ;;  %s3268_s10 = scalar_lea.hbm %s4310_s0, 6144 }
  0x42   : > { %s3263_s25 = scalar_lea.hbm %s3616_s11, 3072  ;;  %p3269_p10 = scmp.lt.u32.totalorder %s3616_s11, %s4310_s0 }
  0x43   : > { %p3264_p8 = scmp.ne.s32.totalorder %s3616_s11, %s3263_s25  ;;  %p3270_p13 = scmp.lt.u32.totalorder %s3268_s10, %s3263_s25 }
  0x44   : > { %p3272_p4 = scmp.lt.u32.totalorder %s3263_s25, %s3616_s11 }
  0x45   : > { %p3266_p9 = pnand %p3264_p8, %p3580_p3  ;;  %p3271_p2 = por %p3270_p13, %p3269_p10 }
  0x47   : > { %p3267_p11 = pneg %p3266_p9  ;;  %p3273_p6 = por %p3272_p4, %p3271_p2 }
  0x49   : > { %p3274_p7 = pnand %p3273_p6, %p3267_p11 }
  0x4b   : > { %3277 = shalt.err (!%p3274_p7)
}
  0x4c   : > { %s3278_s14 = scalar_lea.vmem %s3618_s27, 3072  ;;  %s3444_s1 = smov [#allocation3]  }
  0x4d   : > { %p3279_p12 = scmp.ne.s32.totalorder %s3618_s27, %s3278_s14  ;;  %s3283_s7 = sshll.u32 %s3444_s1, 4  ;;  %s3284_s7 = int_to_ptr.vmem [resolvable:$false] %s3283_s7 }
  0x4e   : > { %s3285_s15 = scalar_lea.vmem %s3284_s7, 6144  ;;  %p3286_p9 = scmp.lt.s32.totalorder %s3618_s27, %s3284_s7 }
  0x4f   : > { %p3281_p1 = pnand %p3279_p12, %p3580_p3  ;;  %p3287_p5 = scmp.lt.s32.totalorder %s3285_s15, %s3278_s14 }
  0x51   : > { %p3282_p8 = pneg %p3281_p1  ;;  %p3288_p10 = por %p3287_p5, %p3286_p9 }
  0x53   : > { %p3289_p13 = pnand %p3288_p10, %p3282_p8 }
  0x55   : > { %3292 = shalt.err (!%p3289_p13)
}
  0x56   : > { %s3445_s25 = smov 384   ;;  %s3446_s10 = smov 24  }
  0x57   : > { %3082 = dma.hbm_to_vmem [thread:$0]  (!%p3560_p0), %s3616_s11, 3072, %s3618_s27, %s235_s16, %s3445_s25, %s3445_s25, %s3446_s10  }
  0x58   : > { %s3065_s17 = smul.u32 6144, %s3437_s22  ;;  %s3298_s11 = scalar_lea.hbm %s4288_s2, 12288 }
  0x59   : > { %s4311_s13 = smul.u32 384, %s3554_s9 }
  0x5a   : > { %s3655_s0 = scalar_lea.hbm %s4288_s2, %s3065_s17 }
  0x5b   : > { %s284_s14 = scalar_lea.vmem [#allocation8], %s4311_s13  ;;  %s3293_s20 = scalar_lea.hbm %s3655_s0, 6144 }
  0x5c   : > { %s291_s1 = sshll.u32 %s284_s14, 4  ;;  %p3294_p5 = scmp.ne.s32.totalorder %s3655_s0, %s3293_s20  ;;  %s3650_s1 = int_to_ptr.vmem [resolvable:$true] %s291_s1 }
  0x5d   : > { %p3299_p4 = scmp.lt.u32.totalorder %s3655_s0, %s4288_s2  ;;  %p3300_p6 = scmp.lt.u32.totalorder %s3298_s11, %s3293_s20 }
  0x5e   : > { %p3296_p11 = pnand %p3294_p5, %p3580_p3  ;;  %p3302_p12 = scmp.lt.u32.totalorder %s3293_s20, %s3655_s0 }
  0x5f   : > { %p3301_p7 = por %p3300_p6, %p3299_p4 }
  0x60   : > { %p3297_p2 = pneg %p3296_p11 }
  0x61   : > { %p3303_p1 = por %p3302_p12, %p3301_p7 }
  0x63   : > { %p3304_p8 = pnand %p3303_p1, %p3297_p2 }
  0x65   : > { %3307 = shalt.err (!%p3304_p8)
}
  0x66   : > { %s3308_s17 = scalar_lea.vmem %s3650_s1, 6144  ;;  %s3447_s14 = smov [#allocation8]  }
  0x67   : > { %p3309_p9 = scmp.ne.s32.totalorder %s3650_s1, %s3308_s17  ;;  %s3313_s7 = sshll.u32 %s3447_s14, 4  ;;  %s3314_s7 = int_to_ptr.vmem [resolvable:$false] %s3313_s7 }
  0x68   : > { %s3315_s15 = scalar_lea.vmem %s3314_s7, 12288  ;;  %p3316_p5 = scmp.lt.s32.totalorder %s3650_s1, %s3314_s7 }
  0x69   : > { %p3311_p10 = pnand %p3309_p9, %p3580_p3  ;;  %p3317_p11 = scmp.lt.s32.totalorder %s3315_s15, %s3308_s17 }
  0x6b   : > { %p3312_p13 = pneg %p3311_p10  ;;  %p3318_p4 = por %p3317_p11, %p3316_p5 }
  0x6d   : > { %p3319_p6 = pnand %p3318_p4, %p3312_p13 }
  0x6f   : > { %3322 = shalt.err (!%p3319_p6)
}
  0x70   : > { %3088 = dma.hbm_to_vmem [thread:$0]  (!%p3560_p0), %s3655_s0, 6144, %s3650_s1, %s3574_s28, %s3445_s25, %s3445_s25, %s3446_s10  }
  0x71   : > { %p4312_p3 = scmp.ne.s32.totalorder %s4309_s29, 0 }
  0x72   : > { %s3685_s20 = sand.u32 (!%p4312_p3), 1, %s3425_s19   ;;  %p4313_p2 = scmp.ne.s32.totalorder (!%p4312_p3), %s4301_s30, 0 }
  0x73   : > { %310 = sbr.rel (%p4312_p3) target bundleno = 2290 (0x8f2), region = 36  ;;  %s313_s27 = scalar_lea.sflag (!%p4312_p3), [#allocation4], %s3685_s20 }
  0x74   : > { %s3066_s26 = smul.u32 (!%p4312_p3), 192, %s3685_s20 }
  0x76   : > { %s3689_s9 = scalar_lea.vmem (!%p4312_p3), [#allocation3], %s3066_s26 }
  0x7a   : > { %3404 = dma.done.wait (%p4313_p2), %s313_s27, 3072  }
  0x7b   : > { %3406 = vsyncadd (%p4313_p2), %s313_s27, 4294964224  ;;  %s321_s0 = sand.u32 1, %s3516_s24   ;;  %s2129_s12 = sshll.u32 %s3685_s20, 3 }
  0x7c   : > { %s322_s28 = scalar_lea.sflag [#allocation7], %s321_s0  ;;  %s3699_s29 = scalar_lea.vmem [#allocation6], %s2129_s12 }
  0x7d   : > { %3408 = dma.done.wait (%p4313_p2), %s322_s28, 6272  }
  0x7e   : > { %3410 = vsyncadd (%p4313_p2), %s322_s28, 4294961024  ;;  %s3067_s25 = smul.u32 384, %s3685_s20  ;;  %v3448_v0 = vmov 0.0|0.0   ;;  %v3449_v1 = vmov 0.0   ;;  %vm3450_vm0 = vmmov 0   ;;  %p385_p0 = scmp.lt.s32.totalorder %s3433_s21, 1 }
  0x7f   : > { %2646 = vmatprep.subr.bf16.mxu1 %v3448_v0  ;;  %537 = vmatprep.mubr.f32.mxu0 %v3449_v1  ;;  %s2195_s13 = smul.u32 168, %s3433_s21  ;;  %s2130_s14 = sshll.u32 %s3685_s20, 6 }
  0x80   : > { %2366 = vmatprep.mubr.msk.f32.mxu1 %vm3450_vm0, %v3449_v1  ;;  %s3710_s24 = scalar_lea.vmem [#allocation8], %s3067_s25  ;;  %s2136_s7 = smul.u32 56, %s3433_s21 }
  0x81   : > { %v401_v2 = vld [vmem:[%s3710_s24 + $0x8] sm:$0xff]  ;;  %v404_v3 = vld [vmem:[%s3710_s24 + $0x20] sm:$0xff]  ;;  %v403_v6 = vld [vmem:[%s3710_s24 + $0x18] sm:$0xff]  ;;  %s386_s30 = scalar_select %p385_p0, %s3433_s21, 1 }
  0x82   : > { %v400_v4 = vld [vmem:[%s3710_s24] sm:$0xff]  ;;  %v3715_v5 = vpack.c.bf16 %v404_v3, %v401_v2  ;;  %v407_v7 = vld [vmem:[%s3710_s24 + $0x38] sm:$0xff]  ;;  %v410_v8 = vld [vmem:[%s3710_s24 + $0x50] sm:$0xff]  ;;  %s453_s17 = scalar_lea.vmem %s3689_s9, %s2195_s13 [#allocation3]  ;;  %s3900_s15 = scalar_lea.vmem [#allocation9], %s2130_s14 }
  0x83   : > { %v3720_v9 = vpack.c.bf16 %v403_v6, %v400_v4  ;;  %v3722_v10 = vpack.c.bf16 %v410_v8, %v407_v7  ;;  %v406_v11 = vld [vmem:[%s3710_s24 + $0x30] sm:$0xff]  ;;  %v409_v12 = vld [vmem:[%s3710_s24 + $0x48] sm:$0xff]  ;;  %v416_v14 = vld [vmem:[%s3710_s24 + $0x80] sm:$0xff]  ;;  %s3068_s10 = smul.u32 3, %s386_s30  ;;  %s636_s26 = scalar_lea.vmem %s3900_s15, %s2136_s7 [#allocation9] }
  0x84   : > { %v413_v13 = vld [vmem:[%s3710_s24 + $0x68] sm:$0xff]  ;;  %2615 = vmatprep.subr.bf16.mxu0 %v3715_v5  ;;  %v3730_v15 = vpack.c.bf16 %v409_v12, %v406_v11  ;;  %v412_v17 = vld [vmem:[%s3710_s24 + $0x60] sm:$0xff]  ;;  %v415_v18 = vld [vmem:[%s3710_s24 + $0x78] sm:$0xff]  ;;  %s2137_s27 = smul.u32 120, %s3433_s21  ;;  %s2158_s11 = sshll.u32 %s3433_s21, 3 }
  0x85   : > { %2617 = vmatpush1.bf16.msra.mxu0 %v3720_v9  ;;  %v3733_v16 = vpack.c.bf16 %v416_v14, %v413_v13  ;;  %v419_v19 = vld [vmem:[%s3710_s24 + $0x98] sm:$0xff]  ;;  %v422_v20 = vld [vmem:[%s3710_s24 + $0xb0] sm:$0xff]  ;;  %v3740_v21 = vpack.c.bf16 %v415_v18, %v412_v17  ;;  %v421_v24 = vld [vmem:[%s3710_s24 + $0xa8] sm:$0xff]  ;;  %v458_v18 = vlaneseq  ;;  %s388_s16 = scalar_lea.vmem %s4289_s3, %s3068_s10  ;;  %s2143_s28 = smul.u32 40, %s3433_s21 }
  0x86   : > { %2619 = vmatprep.subr.bf16.mxu0 %v3722_v10  ;;  %v3743_v22 = vpack.c.bf16 %v422_v20, %v419_v19  ;;  %v418_v23 = vld [vmem:[%s3710_s24 + $0x90] sm:$0xff]  ;;  %v425_v25 = vld [vmem:[%s3710_s24 + $0xc8] sm:$0xff]  ;;  %v428_v26 = vld [vmem:[%s3710_s24 + $0xe0] sm:$0xff]  ;;  %s1987_s0 = scalar_lea.vmem %s3689_s9, %s2137_s27 [#allocation3]  ;;  %s2145_s25 = smul.u32 72, %s3433_s21 }
  0x87   : > { %v402_v27 = vld [vmem:[%s3710_s24 + $0x10] sm:$0xff]  ;;  %v405_v28 = vld [vmem:[%s3710_s24 + $0x28] sm:$0xff]  ;;  %v408_v30 = vld [vmem:[%s3710_s24 + $0x40] sm:$0xff]  ;;  %v3755_v31 = vpack.c.bf16 %v421_v24, %v418_v23  ;;  %v3759_v33 = vpack.c.bf16 %v428_v26, %v425_v25  ;;  %v459_v19 = vshrl.u32 %v458_v18, 7  ;;  %s2151_s30 = smul.u32 24, %s3433_s21  ;;  %s1156_s13 = ssub.s32 4, %s3433_s21 }
  0x88   : > { %v3751_v29 = vpack.c.bf16 %v405_v28, %v402_v27  ;;  %v411_v32 = vld [vmem:[%s3710_s24 + $0x58] sm:$0xff]  ;;  %v424_v34 = vld [vmem:[%s3710_s24 + $0xc0] sm:$0xff]  ;;  %v434_v38 = vld [vmem:[%s3710_s24 + $0x110] sm:$0xff]  ;;  %s2163_s7 = sshll.u32 %s1156_s13, 3  ;;  %s2164_s27 = smul.u32 4294967224, %s3433_s21 }
  0x89   : > { %2621 = vmatpush1.bf16.msra.mxu0 %v3730_v15  ;;  %v427_v35 = vld [vmem:[%s3710_s24 + $0xd8] sm:$0xff]  ;;  %v3765_v37 = vpack.c.bf16 %v411_v32, %v408_v30  ;;  %v414_v39 = vld [vmem:[%s3710_s24 + $0x70] sm:$0xff]  ;;  %v417_v40 = vld [vmem:[%s3710_s24 + $0x88] sm:$0xff]  ;;  %v460_v20 = vsub.s32 0, %v459_v19  ;;  %v464_v24 = vsub.s32 1, %v459_v19  ;;  %s1999_s10 = scalar_lea.vmem %s3900_s15, %s2151_s30 [#allocation9]  ;;  %s2002_s1 = scalar_lea.vmem %s3689_s9, %s2151_s30 [#allocation3] }
  0x8a   : > { %2623 = vmatprep.subr.bf16.mxu0 %v3733_v16  ;;  %v431_v36 = vld [vmem:[%s3710_s24 + $0xf8] sm:$0xff]  ;;  %2648 = vmatpush3.bf16.msra.mxu1 %v3751_v29  ;;  %v3772_v41 = vpack.c.bf16 %v427_v35, %v424_v34  ;;  %v430_v43 = vld [vmem:[%s3710_s24 + $0xf0] sm:$0xff]  ;;  %v433_v44 = vld [vmem:[%s3710_s24 + $0x108] sm:$0xff]  ;;  %v3781_v46 = vpack.c.bf16 %v417_v40, %v414_v39  ;;  %s2178_s30 = smul.u32 4294967256, %s3433_s21  ;;  %p4314_p12 = scmp.ne.s32.totalorder %s4302_s6, 0 }
  0x8b   : > { %2649 = vmatprep.subr.bf16.mxu1 %v3448_v0  ;;  %v3775_v42 = vpack.c.bf16 %v434_v38, %v431_v36  ;;  %v437_v45 = vld [vmem:[%s3710_s24 + $0x128] sm:$0xff]  ;;  %v440_v47 = vld [vmem:[%s3710_s24 + $0x140] sm:$0xff]  ;;  %v423_v49 = vld [vmem:[%s3710_s24 + $0xb8] sm:$0xff]  ;;  %v3788_v50 = vpack.c.bf16 %v433_v44, %v430_v43 }
  0x8c   : > { %v420_v48 = vld [vmem:[%s3710_s24 + $0xa0] sm:$0xff]  ;;  %v3791_v51 = vpack.c.bf16 %v440_v47, %v437_v45  ;;  %v439_v53 = vld [vmem:[%s3710_s24 + $0x138] sm:$0xff]  ;;  %v446_v56 = vld [vmem:[%s3710_s24 + $0x170] sm:$0xff] }
  0x8d   : > { %2625 = vmatpush1.bf16.msra.mxu0 %v3740_v21  ;;  %v436_v52 = vld [vmem:[%s3710_s24 + $0x120] sm:$0xff]  ;;  %v443_v54 = vld [vmem:[%s3710_s24 + $0x158] sm:$0xff]  ;;  %v3797_v55 = vpack.c.bf16 %v423_v49, %v420_v48  ;;  %v426_v57 = vld [vmem:[%s3710_s24 + $0xd0] sm:$0xff]  ;;  %v468_v48 = vsub.s32 2, %v459_v19 }
  0x8e   : > { %2627 = vmatprep.subr.bf16.mxu0 %v3743_v22  ;;  %2651 = vmatpush3.bf16.msra.mxu1 %v3765_v37  ;;  %v429_v58 = vld [vmem:[%s3710_s24 + $0xe8] sm:$0xff]  ;;  %v3804_v59 = vpack.c.bf16 %v439_v53, %v436_v52  ;;  %v3807_v60 = vpack.c.bf16 %v446_v56, %v443_v54  ;;  %v442_v61 = vld [vmem:[%s3710_s24 + $0x150] sm:$0xff]  ;;  %v432_v2 = vld [vmem:[%s3710_s24 + $0x100] sm:$0xff] }
  0x8f   : > { %2652 = vmatprep.subr.bf16.mxu1 %v3448_v0  ;;  %v445_v62 = vld [vmem:[%s3710_s24 + $0x168] sm:$0xff]  ;;  %v3812_v63 = vpack.c.bf16 %v429_v58, %v426_v57  ;;  %v435_v3 = vld [vmem:[%s3710_s24 + $0x118] sm:$0xff]  ;;  %v438_v7 = vld [vmem:[%s3710_s24 + $0x130] sm:$0xff] }
  0x90   : > { %v3818_v4 = vpack.c.bf16 %v445_v62, %v442_v61  ;;  %v3822_v6 = vpack.c.bf16 %v435_v3, %v432_v2  ;;  %v441_v8 = vld [vmem:[%s3710_s24 + $0x148] sm:$0xff]  ;;  %v3829_v11 = vld [vmem:[%s3699_s29] sm:$0xff]  ;;  %v444_v13 = vld [vmem:[%s3710_s24 + $0x160] sm:$0xff]  ;;  %s1991_s29 = scalar_lea.vmem %s3900_s15, %s2143_s28 [#allocation9]  ;;  %s2170_s28 = smul.u32 4294967272, %s3433_s21 }
  0x91   : > { %2629 = vmatpush1.bf16.msra.mxu0 %v3755_v31  ;;  %v3832_v12 = vpack.c.bf16 %v441_v8, %v438_v7  ;;  %v447_v14 = vld [vmem:[%s3710_s24 + $0x178] sm:$0xff]  ;;  %v448_v23 = vld [vmem:[%s388_s16] sm:$0x7]  ;;  %v456_v57 = vld [vmem:[%s453_s17 + $0x10] sm:$0xff]  ;;  %s1995_s24 = scalar_lea.vmem %s3689_s9, %s2145_s25 [#allocation3]  ;;  %s2005_s16 = scalar_lea.vmem %s3900_s15, %s2158_s11 [#allocation9] }
  0x92   : > { %2631 = vmatprep.subr.bf16.mxu0 %v3759_v33  ;;  %2654 = vmatpush3.bf16.msra.mxu1 %v3781_v46  ;;  %v3842_v17 = vpack.c.bf16 %v447_v14, %v444_v13  ;;  %v3888_v25 = vrot.slane %v448_v23, %v460_v20  ;;  %v3890_v26 = vrot.slane %v448_v23, %v464_v24  ;;  %v454_v27 = vld [vmem:[%s453_s17] sm:$0xff]  ;;  %v455_v36 = vld [vmem:[%s453_s17 + $0x8] sm:$0xff]  ;;  %s2196_s17 = smul.u32 24, %s1156_s13 }
  0x93   : > { %2655 = vmatprep.subr.bf16.mxu1 %v3448_v0  ;;  %v3894_v49 = vrot.slane %v448_v23, %v468_v48  ;;  %s2172_s25 = smul.u32 4294967176, %s3433_s21 }
  0x94   : > { %s1159_s14 = scalar_lea.vmem %s3689_s9, %s2196_s17 [#allocation3]  ;;  %s1877_s17 = sshll.u32 %s3900_s15, 4  ;;  %s4208_s17 = int_to_ptr.vmem [resolvable:$true] %s1877_s17 }
  0x95   : > { %2633 = vmatpush1.bf16.msra.mxu0 %v3772_v41 }
  0x96   : > { %2635 = vmatprep.subr.bf16.mxu0 %v3775_v42  ;;  %2657 = vmatpush3.bf16.msra.mxu1 %v3797_v55 }
  0x97   : > { %2658 = vmatprep.subr.bf16.mxu1 %v3448_v0 }
  0x99   : > { %2637 = vmatpush1.bf16.msra.mxu0 %v3788_v50 }
  0x9a   : > { %2639 = vmatprep.subr.bf16.mxu0 %v3791_v51  ;;  %2660 = vmatpush3.bf16.msra.mxu1 %v3812_v63 }
  0x9b   : > { %2661 = vmatprep.subr.bf16.mxu1 %v3448_v0 }
  0x9d   : > { %2641 = vmatpush1.bf16.msra.mxu0 %v3804_v59 }
  0x9e   : > { %2643 = vmatprep.subr.bf16.mxu0 %v3807_v60  ;;  %2663 = vmatpush3.bf16.msra.mxu1 %v3822_v6 }
  0x9f   : > { %2664 = vmatprep.subr.bf16.mxu1 %v3448_v0 }
  0xa1   : > { %2645 = vmatpush1.bf16.msra.mxu0 %v3818_v4 }
  0xa2   : > { %2671 = vmatprep.subr.bf16.mxu0 %v3715_v5  ;;  %2666 = vmatpush3.bf16.msra.mxu1 %v3832_v12 }
  0xa3   : > { %2667 = vmatprep.subr.bf16.mxu1 %v3448_v0 }
  0xa4   : > { %538 = vmatmul.mubr.f32.vlgmr.msra.gmra.mrb[0].mxu0 %v3829_v11 }
  0xa5   : > { %2673 = vmatpush1.bf16.msra.mxu0 %v3720_v9  ;;  %710 = vmatprep.mubr.f32.mxu0 %v3449_v1 }
  0xa6   : > { %2675 = vmatprep.subr.bf16.mxu0 %v3722_v10  ;;  %2669 = vmatpush3.bf16.msra.mxu1 %v3842_v17 }
  0xa7   : > { %2702 = vmatprep.subr.bf16.mxu1 %v3448_v0 }
  0xa9   : > { %2677 = vmatpush1.bf16.msra.mxu0 %v3730_v15  ;;  %2367 = vmatmul.mubr.f32.vlgmr.msra.gmra.mrb[0].mxu1 %v3829_v11 }
  0xaa   : > { %2679 = vmatprep.subr.bf16.mxu0 %v3733_v16  ;;  %2704 = vmatpush3.bf16.msra.mxu1 %v3751_v29 }
  0xab   : > { %2705 = vmatprep.subr.bf16.mxu1 %v3448_v0  ;;  %2401 = vmatprep.mubr.msk.f32.mxu1 %vm3450_vm0, %v3449_v1 }
  0xad   : > { %2681 = vmatpush1.bf16.msra.mxu0 %v3740_v21 }
  0xae   : > { %2683 = vmatprep.subr.bf16.mxu0 %v3743_v22  ;;  %2707 = vmatpush3.bf16.msra.mxu1 %v3765_v37 }
  0xaf   : > { %2708 = vmatprep.subr.bf16.mxu1 %v3448_v0 }
  0xb1   : > { %2685 = vmatpush1.bf16.msra.mxu0 %v3755_v31 }
  0xb2   : > { %2687 = vmatprep.subr.bf16.mxu0 %v3759_v33  ;;  %2710 = vmatpush3.bf16.msra.mxu1 %v3781_v46 }
  0xb3   : > { %2711 = vmatprep.subr.bf16.mxu1 %v3448_v0 }
  0xb5   : > { %2689 = vmatpush1.bf16.msra.mxu0 %v3772_v41 }
  0xb6   : > { %2691 = vmatprep.subr.bf16.mxu0 %v3775_v42  ;;  %2713 = vmatpush3.bf16.msra.mxu1 %v3797_v55 }
  0xb7   : > { %2714 = vmatprep.subr.bf16.mxu1 %v3448_v0 }
  0xb9   : > { %2693 = vmatpush1.bf16.msra.mxu0 %v3788_v50 }
  0xba   : > { %2695 = vmatprep.subr.bf16.mxu0 %v3791_v51  ;;  %2716 = vmatpush3.bf16.msra.mxu1 %v3812_v63 }
  0xbb   : > { %2717 = vmatprep.subr.bf16.mxu1 %v3448_v0 }
  0xbd   : > { %2697 = vmatpush1.bf16.msra.mxu0 %v3804_v59 }
  0xbe   : > { %2699 = vmatprep.subr.bf16.mxu0 %v3807_v60  ;;  %2719 = vmatpush3.bf16.msra.mxu1 %v3822_v6 }
  0xbf   : > { %2720 = vmatprep.subr.bf16.mxu1 %v3448_v0 }
  0xc1   : > { %2701 = vmatpush1.bf16.msra.mxu0 %v3818_v4 }
  0xc2   : > { %2727 = vmatprep.subr.bf16.mxu0 %v3715_v5  ;;  %2722 = vmatpush3.bf16.msra.mxu1 %v3832_v12 }
  0xc3   : > { %2723 = vmatprep.subr.bf16.mxu1 %v3448_v0 }
  0xc6   : > { %2725 = vmatpush3.bf16.msra.mxu1 %v3842_v17 }
  0xc7   : > { %2758 = vmatprep.subr.bf16.mxu1 %v3448_v0 }
 0x177   : > { %v539_v28 = vpop.f32.mrb[0].mxu0 }
 0x178   : > { %v540_v30 = vadd.f32 %v539_v28, %v3888_v25  ;;  %v541_v32 = vpop.f32.mrb[1].mxu0  ;;  %v2139_v28 = vld [vmem:[%s1987_s0 + $0x20] sm:$0xff] }
 0x179   : > { %v542_v34 = vadd.f32 %v541_v32, %v3890_v26 }
 0x17a   : > { %v614_v35 = vadd.f32 %v540_v30, %v454_v27 }
 0x17b   : > { %v621_v39 = vadd.f32 %v542_v34, %v455_v36 }
 0x17c   : > { %v2134_v38 = vmul.f32 -1.442695, %v614_v35  ;;  %v610_v40 = vpop.f32.mrb[0].mxu1 }
 0x17d   : > { %v2135_v43 = vmul.f32 -1.442695, %v621_v39  ;;  %v2368_v44 = vpop.f32.mrb[1].mxu1  ;;  %v611_v54 = vadd.f32 %v610_v40, %v3894_v49 }
 0x17e   : > { %3153 = vpow2.f32 %v2134_v38  ;;  %v2140_v44 = vld [vmem:[%s1987_s0 + $0x28] sm:$0xff] }
 0x17f   : > { %3155 = vpow2.f32 %v2135_v43 }
 0x188   : > { %v3154_v45 = vpop.eup %3153 }
 0x189   : > { %v618_v47 = vadd.f32 1.0, %v3154_v45  ;;  %v3156_v52 = vpop.eup %3155 }
 0x18a   : > { %v625_v53 = vadd.f32 1.0, %v3156_v52 }
 0x18b   : > { %3157 = vrcp.f32 %v618_v47 }
 0x18c   : > { %3159 = vrcp.f32 %v625_v53 }
 0x195   : > { %v3158_v56 = vpop.eup %3157 }
 0x196   : > { %v628_v58 = vmul.f32 %v3158_v56, %v611_v54  ;;  %v3160_v62 = vpop.eup %3159 }
 0x197   : > { %v631_v2 = vsub.f32 1.0, %v3160_v62  ;;  %v633_v8 = vmul.f32 %v3160_v62, %v3829_v11  ;;  %v2138_v11 = vld [vmem:[%s1987_s0 + $0x18] sm:$0xff]  ;;  %s2013_s0 = scalar_lea.vmem %s3689_s9, %s2164_s27 [#allocation3]  ;;  %s2192_s27 = sshll.u32 %s3433_s21, 7 }
 0x198   : > { %v629_v61 = vadd.f32 %v628_v58, %v456_v57  ;;  %v2146_v58 = vld [vmem:[%s1995_s24 + $0x30] sm:$0xff] }
 0x19a   : > { %3161 = vtanh.f32 %v629_v61 }
 0x1a4   : > { %v3162_v3 = vpop.eup %3161 }
 0x1a5   : > { %v632_v7 = vmul.f32 %v3162_v3, %v631_v2 }
 0x1a7   : > { %v3903_v13 = vadd.f32 %v633_v8, %v632_v7 }
 0x1a9   : > { %637 = vst [vmem:[%s636_s26] sm:$0xff] %v3903_v13  ;;  %711 = vmatmul.mubr.f32.vlgmr.msra.gmra.mrb[2].mxu0 %v3903_v13  ;;  %2402 = vmatmul.mubr.f32.vlgmr.msra.gmra.mrb[2].mxu1 %v3903_v13  ;;  %s1326_s26 = scalar_lea.vmem %s3900_s15, %s2163_s7 [#allocation9] }
 0x1aa   : > { %2729 = vmatpush1.bf16.msra.mxu0 %v3720_v9  ;;  %2760 = vmatpush3.bf16.msra.mxu1 %v3751_v29 }
 0x1ab   : > { %2731 = vmatprep.subr.bf16.mxu0 %v3722_v10  ;;  %2761 = vmatprep.subr.bf16.mxu1 %v3448_v0 }
 0x1ac   : > { %883 = vmatprep.mubr.f32.mxu0 %v3449_v1  ;;  %2436 = vmatprep.mubr.msk.f32.mxu1 %vm3450_vm0, %v3449_v1 }
 0x1ae   : > { %2733 = vmatpush1.bf16.msra.mxu0 %v3730_v15  ;;  %2763 = vmatpush3.bf16.msra.mxu1 %v3765_v37 }
 0x1af   : > { %2735 = vmatprep.subr.bf16.mxu0 %v3733_v16  ;;  %2764 = vmatprep.subr.bf16.mxu1 %v3448_v0 }
 0x1b2   : > { %2737 = vmatpush1.bf16.msra.mxu0 %v3740_v21  ;;  %2766 = vmatpush3.bf16.msra.mxu1 %v3781_v46 }
 0x1b3   : > { %2739 = vmatprep.subr.bf16.mxu0 %v3743_v22  ;;  %2767 = vmatprep.subr.bf16.mxu1 %v3448_v0 }
 0x1b6   : > { %2741 = vmatpush1.bf16.msra.mxu0 %v3755_v31  ;;  %2769 = vmatpush3.bf16.msra.mxu1 %v3797_v55 }
 0x1b7   : > { %2743 = vmatprep.subr.bf16.mxu0 %v3759_v33  ;;  %2770 = vmatprep.subr.bf16.mxu1 %v3448_v0 }
 0x1ba   : > { %2745 = vmatpush1.bf16.msra.mxu0 %v3772_v41  ;;  %2772 = vmatpush3.bf16.msra.mxu1 %v3812_v63 }
 0x1bb   : > { %2747 = vmatprep.subr.bf16.mxu0 %v3775_v42  ;;  %2773 = vmatprep.subr.bf16.mxu1 %v3448_v0 }
 0x1be   : > { %2749 = vmatpush1.bf16.msra.mxu0 %v3788_v50  ;;  %2775 = vmatpush3.bf16.msra.mxu1 %v3822_v6 }
 0x1bf   : > { %2751 = vmatprep.subr.bf16.mxu0 %v3791_v51  ;;  %2776 = vmatprep.subr.bf16.mxu1 %v3448_v0 }
 0x1c2   : > { %2753 = vmatpush1.bf16.msra.mxu0 %v3804_v59  ;;  %2778 = vmatpush3.bf16.msra.mxu1 %v3832_v12 }
 0x1c3   : > { %2755 = vmatprep.subr.bf16.mxu0 %v3807_v60  ;;  %2779 = vmatprep.subr.bf16.mxu1 %v3448_v0 }
 0x1c6   : > { %2757 = vmatpush1.bf16.msra.mxu0 %v3818_v4  ;;  %2781 = vmatpush3.bf16.msra.mxu1 %v3842_v17 }
 0x1c7   : > { %2783 = vmatprep.subr.bf16.mxu0 %v3715_v5  ;;  %2814 = vmatprep.subr.bf16.mxu1 %v3448_v0 }
 0x27c   : > { %v712_v14 = vpop.f32.mrb[2].mxu0  ;;  %v783_v18 = vpop.f32.mrb[2].mxu1 }
 0x27d   : > { %v713_v19 = vadd.f32 %v712_v14, %v3888_v25  ;;  %v714_v20 = vpop.f32.mrb[3].mxu0  ;;  %v2403_v23 = vpop.f32.mrb[3].mxu1  ;;  %v784_v40 = vadd.f32 %v783_v18, %v3894_v49 }
 0x27e   : > { %v715_v24 = vadd.f32 %v714_v20, %v3890_v26 }
 0x27f   : > { %v787_v27 = vadd.f32 %v2138_v11, %v713_v19  ;;  %v2147_v11 = vld [vmem:[%s1995_s24 + $0x38] sm:$0xff] }
 0x280   : > { %v794_v32 = vadd.f32 %v2139_v28, %v715_v24 }
 0x281   : > { %v2141_v30 = vmul.f32 -1.442695, %v787_v27 }
 0x282   : > { %v2142_v34 = vmul.f32 -1.442695, %v794_v32  ;;  %v2148_v32 = vld [vmem:[%s1995_s24 + $0x40] sm:$0xff]  ;;  %s2021_s24 = scalar_lea.vmem %s3689_s9, %s2172_s25 [#allocation3]  ;;  %s4213_s25 = scalar_lea.hbm %s4291_s5, %s2192_s27 }
 0x283   : > { %3163 = vpow2.f32 %v2141_v30 }
 0x284   : > { %3165 = vpow2.f32 %v2142_v34 }
 0x28d   : > { %v3164_v35 = vpop.eup %3163 }
 0x28e   : > { %v791_v36 = vadd.f32 1.0, %v3164_v35  ;;  %v3166_v38 = vpop.eup %3165 }
 0x28f   : > { %v798_v39 = vadd.f32 1.0, %v3166_v38 }
 0x290   : > { %3167 = vrcp.f32 %v791_v36 }
 0x291   : > { %3169 = vrcp.f32 %v798_v39 }
 0x29a   : > { %v3168_v43 = vpop.eup %3167 }
 0x29b   : > { %v801_v45 = vmul.f32 %v3168_v43, %v784_v40  ;;  %v3170_v48 = vpop.eup %3169 }
 0x29c   : > { %v804_v52 = vsub.f32 1.0, %v3170_v48  ;;  %v806_v56 = vmul.f32 %v3170_v48, %v3903_v13 }
 0x29d   : > { %v802_v47 = vadd.f32 %v2140_v44, %v801_v45  ;;  %v2153_v45 = vld [vmem:[%s2002_s1 + $0x48] sm:$0xff] }
 0x29f   : > { %3171 = vtanh.f32 %v802_v47 }
 0x2a9   : > { %v3172_v53 = vpop.eup %3171 }
 0x2aa   : > { %v805_v54 = vmul.f32 %v3172_v53, %v804_v52  ;;  %v2154_v53 = vld [vmem:[%s2002_s1 + $0x50] sm:$0xff] }
 0x2ac   : > { %v3951_v57 = vadd.f32 %v806_v56, %v805_v54 }
 0x2ae   : > { %2144 = vst [vmem:[%s1991_s29 + $0x8] sm:$0xff] %v3951_v57  ;;  %884 = vmatmul.mubr.f32.vlgmr.msra.gmra.mrb[4].mxu0 %v3951_v57  ;;  %2437 = vmatmul.mubr.f32.vlgmr.msra.gmra.mrb[4].mxu1 %v3951_v57  ;;  %s2017_s29 = scalar_lea.vmem %s3900_s15, %s2170_s28 [#allocation9] }
 0x2af   : > { %2785 = vmatpush1.bf16.msra.mxu0 %v3720_v9  ;;  %2816 = vmatpush3.bf16.msra.mxu1 %v3751_v29 }
 0x2b0   : > { %2787 = vmatprep.subr.bf16.mxu0 %v3722_v10  ;;  %2817 = vmatprep.subr.bf16.mxu1 %v3448_v0 }
 0x2b1   : > { %1055 = vmatprep.mubr.f32.mxu0 %v3449_v1  ;;  %2471 = vmatprep.mubr.msk.f32.mxu1 %vm3450_vm0, %v3449_v1 }
 0x2b3   : > { %2789 = vmatpush1.bf16.msra.mxu0 %v3730_v15  ;;  %2819 = vmatpush3.bf16.msra.mxu1 %v3765_v37 }
 0x2b4   : > { %2791 = vmatprep.subr.bf16.mxu0 %v3733_v16  ;;  %2820 = vmatprep.subr.bf16.mxu1 %v3448_v0 }
 0x2b7   : > { %2793 = vmatpush1.bf16.msra.mxu0 %v3740_v21  ;;  %2822 = vmatpush3.bf16.msra.mxu1 %v3781_v46 }
 0x2b8   : > { %2795 = vmatprep.subr.bf16.mxu0 %v3743_v22  ;;  %2823 = vmatprep.subr.bf16.mxu1 %v3448_v0 }
 0x2bb   : > { %2797 = vmatpush1.bf16.msra.mxu0 %v3755_v31  ;;  %2825 = vmatpush3.bf16.msra.mxu1 %v3797_v55 }
 0x2bc   : > { %2799 = vmatprep.subr.bf16.mxu0 %v3759_v33  ;;  %2826 = vmatprep.subr.bf16.mxu1 %v3448_v0 }
 0x2bf   : > { %2801 = vmatpush1.bf16.msra.mxu0 %v3772_v41  ;;  %2828 = vmatpush3.bf16.msra.mxu1 %v3812_v63 }
 0x2c0   : > { %2803 = vmatprep.subr.bf16.mxu0 %v3775_v42  ;;  %2829 = vmatprep.subr.bf16.mxu1 %v3448_v0 }
 0x2c3   : > { %2805 = vmatpush1.bf16.msra.mxu0 %v3788_v50  ;;  %2831 = vmatpush3.bf16.msra.mxu1 %v3822_v6 }
 0x2c4   : > { %2807 = vmatprep.subr.bf16.mxu0 %v3791_v51  ;;  %2832 = vmatprep.subr.bf16.mxu1 %v3448_v0 }
 0x2c7   : > { %2809 = vmatpush1.bf16.msra.mxu0 %v3804_v59  ;;  %2834 = vmatpush3.bf16.msra.mxu1 %v3832_v12 }
 0x2c8   : > { %2811 = vmatprep.subr.bf16.mxu0 %v3807_v60  ;;  %2835 = vmatprep.subr.bf16.mxu1 %v3448_v0 }
 0x2cb   : > { %2813 = vmatpush1.bf16.msra.mxu0 %v3818_v4  ;;  %2837 = vmatpush3.bf16.msra.mxu1 %v3842_v17 }
 0x2cc   : > { %2839 = vmatprep.subr.bf16.mxu0 %v3715_v5  ;;  %2870 = vmatprep.subr.bf16.mxu1 %v3448_v0 }
 0x381   : > { %v885_v61 = vpop.f32.mrb[4].mxu0  ;;  %v956_v62 = vpop.f32.mrb[4].mxu1 }
 0x382   : > { %v886_v2 = vadd.f32 %v885_v61, %v3888_v25  ;;  %v887_v3 = vpop.f32.mrb[5].mxu0  ;;  %v2438_v7 = vpop.f32.mrb[5].mxu1  ;;  %v957_v28 = vadd.f32 %v956_v62, %v3894_v49 }
 0x383   : > { %v888_v8 = vadd.f32 %v887_v3, %v3890_v26 }
 0x384   : > { %v960_v13 = vadd.f32 %v2146_v58, %v886_v2 }
 0x385   : > { %v967_v18 = vadd.f32 %v2147_v11, %v888_v8 }
 0x386   : > { %v2149_v14 = vmul.f32 -1.442695, %v960_v13 }
 0x387   : > { %v2150_v19 = vmul.f32 -1.442695, %v967_v18  ;;  %v2155_v18 = vld [vmem:[%s2002_s1 + $0x58] sm:$0xff]  ;;  %s2180_s1 = smul.u32 4294967128, %s3433_s21 }
 0x388   : > { %3173 = vpow2.f32 %v2149_v14 }
 0x389   : > { %3175 = vpow2.f32 %v2150_v19  ;;  %s2029_s11 = scalar_lea.vmem %s3689_s9, %s2180_s1 [#allocation3]  ;;  %s2186_s9 = smul.u32 4294967240, %s3433_s21 }
 0x38b   : > { %s2033_s13 = scalar_lea.vmem %s3900_s15, %s2186_s9 [#allocation9] }
 0x392   : > { %v3174_v20 = vpop.eup %3173 }
 0x393   : > { %v964_v23 = vadd.f32 1.0, %v3174_v20  ;;  %v3176_v24 = vpop.eup %3175 }
 0x394   : > { %v971_v27 = vadd.f32 1.0, %v3176_v24 }
 0x395   : > { %3177 = vrcp.f32 %v964_v23 }
 0x396   : > { %3179 = vrcp.f32 %v971_v27 }
 0x39f   : > { %v3178_v30 = vpop.eup %3177 }
 0x3a0   : > { %v974_v34 = vmul.f32 %v3178_v30, %v957_v28  ;;  %v3180_v36 = vpop.eup %3179 }
 0x3a1   : > { %v977_v38 = vsub.f32 1.0, %v3180_v36  ;;  %v979_v43 = vmul.f32 %v3180_v36, %v3951_v57 }
 0x3a2   : > { %v975_v35 = vadd.f32 %v2148_v32, %v974_v34  ;;  %v1160_v34 = vld [vmem:[%s1159_s14] sm:$0xff] }
 0x3a4   : > { %3181 = vtanh.f32 %v975_v35 }
 0x3ae   : > { %v3182_v39 = vpop.eup %3181 }
 0x3af   : > { %v978_v40 = vmul.f32 %v3182_v39, %v977_v38 }
 0x3b1   : > { %v4001_v44 = vadd.f32 %v979_v43, %v978_v40 }
 0x3b3   : > { %1056 = vmatmul.mubr.f32.vlgmr.msra.gmra.mrb[6].mxu0 %v4001_v44  ;;  %2472 = vmatmul.mubr.f32.vlgmr.msra.gmra.mrb[6].mxu1 %v4001_v44  ;;  %2152 = vst [vmem:[%s1999_s10 + $0x10] sm:$0xff] %v4001_v44  ;;  %s2025_s10 = scalar_lea.vmem %s3900_s15, %s2178_s30 [#allocation9] }
 0x3b4   : > { %2841 = vmatpush1.bf16.msra.mxu0 %v3720_v9  ;;  %2872 = vmatpush3.bf16.msra.mxu1 %v3751_v29 }
 0x3b5   : > { %2843 = vmatprep.subr.bf16.mxu0 %v3722_v10  ;;  %2873 = vmatprep.subr.bf16.mxu1 %v3448_v0 }
 0x3b6   : > { %1227 = vmatprep.mubr.f32.mxu0 %v3449_v1  ;;  %2506 = vmatprep.mubr.msk.f32.mxu1 %vm3450_vm0, %v3449_v1 }
 0x3b8   : > { %2845 = vmatpush1.bf16.msra.mxu0 %v3730_v15  ;;  %2875 = vmatpush3.bf16.msra.mxu1 %v3765_v37 }
 0x3b9   : > { %2847 = vmatprep.subr.bf16.mxu0 %v3733_v16  ;;  %2876 = vmatprep.subr.bf16.mxu1 %v3448_v0 }
 0x3bc   : > { %2849 = vmatpush1.bf16.msra.mxu0 %v3740_v21  ;;  %2878 = vmatpush3.bf16.msra.mxu1 %v3781_v46 }
 0x3bd   : > { %2851 = vmatprep.subr.bf16.mxu0 %v3743_v22  ;;  %2879 = vmatprep.subr.bf16.mxu1 %v3448_v0 }
 0x3c0   : > { %2853 = vmatpush1.bf16.msra.mxu0 %v3755_v31  ;;  %2881 = vmatpush3.bf16.msra.mxu1 %v3797_v55 }
 0x3c1   : > { %2855 = vmatprep.subr.bf16.mxu0 %v3759_v33  ;;  %2882 = vmatprep.subr.bf16.mxu1 %v3448_v0 }
 0x3c4   : > { %2857 = vmatpush1.bf16.msra.mxu0 %v3772_v41  ;;  %2884 = vmatpush3.bf16.msra.mxu1 %v3812_v63 }
 0x3c5   : > { %2859 = vmatprep.subr.bf16.mxu0 %v3775_v42  ;;  %2885 = vmatprep.subr.bf16.mxu1 %v3448_v0 }
 0x3c8   : > { %2861 = vmatpush1.bf16.msra.mxu0 %v3788_v50  ;;  %2887 = vmatpush3.bf16.msra.mxu1 %v3822_v6 }
 0x3c9   : > { %2863 = vmatprep.subr.bf16.mxu0 %v3791_v51  ;;  %2888 = vmatprep.subr.bf16.mxu1 %v3448_v0 }
 0x3cc   : > { %2865 = vmatpush1.bf16.msra.mxu0 %v3804_v59  ;;  %2890 = vmatpush3.bf16.msra.mxu1 %v3832_v12 }
 0x3cd   : > { %2867 = vmatprep.subr.bf16.mxu0 %v3807_v60  ;;  %2891 = vmatprep.subr.bf16.mxu1 %v3448_v0 }
 0x3d0   : > { %2869 = vmatpush1.bf16.msra.mxu0 %v3818_v4  ;;  %2893 = vmatpush3.bf16.msra.mxu1 %v3842_v17 }
 0x3d1   : > { %2895 = vmatprep.subr.bf16.mxu0 %v3715_v5  ;;  %2926 = vmatprep.subr.bf16.mxu1 %v3448_v0 }
 0x486   : > { %v1057_v47 = vpop.f32.mrb[6].mxu0  ;;  %v1128_v48 = vpop.f32.mrb[6].mxu1 }
 0x487   : > { %v1058_v52 = vadd.f32 %v1057_v47, %v3888_v25  ;;  %v1059_v54 = vpop.f32.mrb[7].mxu0  ;;  %v2473_v56 = vpop.f32.mrb[7].mxu1  ;;  %v1129_v11 = vadd.f32 %v1128_v48, %v3894_v49 }
 0x488   : > { %v1060_v57 = vadd.f32 %v1059_v54, %v3890_v26 }
 0x489   : > { %v1132_v58 = vadd.f32 %v2153_v45, %v1058_v52  ;;  %v1161_v45 = vld [vmem:[%s1159_s14 + $0x8] sm:$0xff] }
 0x48a   : > { %v1139_v61 = vadd.f32 %v2154_v53, %v1060_v57 }
 0x48b   : > { %v2156_v62 = vmul.f32 -1.442695, %v1132_v58 }
 0x48c   : > { %v2157_v2 = vmul.f32 -1.442695, %v1139_v61 }
 0x48d   : > { %3183 = vpow2.f32 %v2156_v62  ;;  %v1162_v62 = vld [vmem:[%s1159_s14 + $0x10] sm:$0xff] }
 0x48e   : > { %3185 = vpow2.f32 %v2157_v2 }
 0x497   : > { %v3184_v3 = vpop.eup %3183 }
 0x498   : > { %v1136_v7 = vadd.f32 1.0, %v3184_v3  ;;  %v3186_v8 = vpop.eup %3185 }
 0x499   : > { %v1143_v13 = vadd.f32 1.0, %v3186_v8 }
 0x49a   : > { %3187 = vrcp.f32 %v1136_v7 }
 0x49b   : > { %3189 = vrcp.f32 %v1143_v13 }
 0x4a4   : > { %v3188_v14 = vpop.eup %3187 }
 0x4a5   : > { %v1146_v19 = vmul.f32 %v3188_v14, %v1129_v11  ;;  %v3190_v23 = vpop.eup %3189 }
 0x4a6   : > { %v1149_v24 = vsub.f32 1.0, %v3190_v23  ;;  %v1151_v30 = vmul.f32 %v3190_v23, %v4001_v44 }
 0x4a7   : > { %v1147_v20 = vadd.f32 %v2155_v18, %v1146_v19  ;;  %v2165_v19 = vld [vmem:[%s2013_s0 + $0x78] sm:$0xff] }
 0x4a9   : > { %3191 = vtanh.f32 %v1147_v20 }
 0x4b3   : > { %v3192_v27 = vpop.eup %3191 }
 0x4b4   : > { %v1150_v28 = vmul.f32 %v3192_v27, %v1149_v24 }
 0x4b6   : > { %v4050_v32 = vadd.f32 %v1151_v30, %v1150_v28 }
 0x4b8   : > { %2159 = vst [vmem:[%s2005_s16 + $0x18] sm:$0xff] %v4050_v32  ;;  %1228 = vmatmul.mubr.f32.vlgmr.msra.gmra.mrb[8].mxu0 %v4050_v32  ;;  %2507 = vmatmul.mubr.f32.vlgmr.msra.gmra.mrb[8].mxu1 %v4050_v32  ;;  %s2197_s16 = sshll.u32 %s3433_s21, 10  ;;  %s3323_s21 = scalar_lea.vmem %s4208_s17, 1024 }
 0x4b9   : > { %2897 = vmatpush1.bf16.msra.mxu0 %v3720_v9  ;;  %2928 = vmatpush3.bf16.msra.mxu1 %v3751_v29  ;;  %p3324_p7 = scmp.ne.s32.totalorder %s4208_s17, %s3323_s21 }
 0x4ba   : > { %2899 = vmatprep.subr.bf16.mxu0 %v3722_v10  ;;  %2929 = vmatprep.subr.bf16.mxu1 %v3448_v0 }
 0x4bb   : > { %1400 = vmatprep.mubr.f32.mxu0 %v3449_v1  ;;  %2541 = vmatprep.mubr.msk.f32.mxu1 %vm3450_vm0, %v3449_v1  ;;  %p3325_p1 = pnand %p3324_p7, %p4314_p12 }
 0x4bd   : > { %2901 = vmatpush1.bf16.msra.mxu0 %v3730_v15  ;;  %2931 = vmatpush3.bf16.msra.mxu1 %v3765_v37  ;;  %p3326_p8 = pneg %p3325_p1 }
 0x4be   : > { %2903 = vmatprep.subr.bf16.mxu0 %v3733_v16  ;;  %2932 = vmatprep.subr.bf16.mxu1 %v3448_v0 }
 0x4c1   : > { %2905 = vmatpush1.bf16.msra.mxu0 %v3740_v21  ;;  %2934 = vmatpush3.bf16.msra.mxu1 %v3781_v46 }
 0x4c2   : > { %2907 = vmatprep.subr.bf16.mxu0 %v3743_v22  ;;  %2935 = vmatprep.subr.bf16.mxu1 %v3448_v0 }
 0x4c5   : > { %2909 = vmatpush1.bf16.msra.mxu0 %v3755_v31  ;;  %2937 = vmatpush3.bf16.msra.mxu1 %v3797_v55 }
 0x4c6   : > { %2911 = vmatprep.subr.bf16.mxu0 %v3759_v33  ;;  %2938 = vmatprep.subr.bf16.mxu1 %v3448_v0 }
 0x4c9   : > { %2913 = vmatpush1.bf16.msra.mxu0 %v3772_v41  ;;  %2940 = vmatpush3.bf16.msra.mxu1 %v3812_v63 }
 0x4ca   : > { %2915 = vmatprep.subr.bf16.mxu0 %v3775_v42  ;;  %2941 = vmatprep.subr.bf16.mxu1 %v3448_v0 }
 0x4cd   : > { %2917 = vmatpush1.bf16.msra.mxu0 %v3788_v50  ;;  %2943 = vmatpush3.bf16.msra.mxu1 %v3822_v6 }
 0x4ce   : > { %2919 = vmatprep.subr.bf16.mxu0 %v3791_v51  ;;  %2944 = vmatprep.subr.bf16.mxu1 %v3448_v0 }
 0x4d1   : > { %2921 = vmatpush1.bf16.msra.mxu0 %v3804_v59  ;;  %2946 = vmatpush3.bf16.msra.mxu1 %v3832_v12 }
 0x4d2   : > { %2923 = vmatprep.subr.bf16.mxu0 %v3807_v60  ;;  %2947 = vmatprep.subr.bf16.mxu1 %v3448_v0 }
 0x4d5   : > { %2925 = vmatpush1.bf16.msra.mxu0 %v3818_v4  ;;  %2949 = vmatpush3.bf16.msra.mxu1 %v3842_v17 }
 0x4d6   : > { %2951 = vmatprep.subr.bf16.mxu0 %v3715_v5  ;;  %2982 = vmatprep.subr.bf16.mxu1 %v3448_v0 }
 0x58b   : > { %v1229_v35 = vpop.f32.mrb[8].mxu0  ;;  %v1300_v36 = vpop.f32.mrb[8].mxu1 }
 0x58c   : > { %v1230_v38 = vadd.f32 %v1229_v35, %v3888_v25  ;;  %v1231_v39 = vpop.f32.mrb[9].mxu0  ;;  %v2508_v40 = vpop.f32.mrb[9].mxu1  ;;  %v1301_v58 = vadd.f32 %v1300_v36, %v3894_v49 }
 0x58d   : > { %v1232_v43 = vadd.f32 %v1231_v39, %v3890_v26 }
 0x58e   : > { %v1304_v44 = vadd.f32 %v1230_v38, %v1160_v34  ;;  %v2166_v34 = vld [vmem:[%s2013_s0 + $0x80] sm:$0xff] }
 0x58f   : > { %v1311_v48 = vadd.f32 %v1232_v43, %v1161_v45 }
 0x590   : > { %v2161_v47 = vmul.f32 -1.442695, %v1304_v44 }
 0x591   : > { %v2162_v52 = vmul.f32 -1.442695, %v1311_v48 }
 0x592   : > { %3193 = vpow2.f32 %v2161_v47  ;;  %v2167_v47 = vld [vmem:[%s2013_s0 + $0x88] sm:$0xff]  ;;  %s379_s0 = scalar_lea.vmem [#allocation10], %s2129_s12  ;;  %s3451_s12 = smov [#allocation9]  }
 0x593   : > { %3195 = vpow2.f32 %v2162_v52  ;;  %s1893_s28 = sshll.u32 %s379_s0, 4  ;;  %s3327_s30 = sshll.u32 %s3451_s12, 4  ;;  %s4215_s28 = int_to_ptr.vmem [resolvable:$true] %s1893_s28  ;;  %s3328_s30 = int_to_ptr.vmem [resolvable:$false] %s3327_s30 }
 0x594   : > { %p3330_p9 = scmp.lt.s32.totalorder %s4208_s17, %s3328_s30 }
 0x59c   : > { %v3194_v53 = vpop.eup %3193 }
 0x59d   : > { %v1308_v54 = vadd.f32 1.0, %v3194_v53  ;;  %v3196_v56 = vpop.eup %3195 }
 0x59e   : > { %v1315_v57 = vadd.f32 1.0, %v3196_v56 }
 0x59f   : > { %3197 = vrcp.f32 %v1308_v54 }
 0x5a0   : > { %3199 = vrcp.f32 %v1315_v57 }
 0x5a9   : > { %v3198_v61 = vpop.eup %3197 }
 0x5aa   : > { %v1318_v2 = vmul.f32 %v3198_v61, %v1301_v58  ;;  %v3200_v7 = vpop.eup %3199 }
 0x5ab   : > { %v1321_v8 = vsub.f32 1.0, %v3200_v7  ;;  %v1323_v14 = vmul.f32 %v3200_v7, %v4050_v32 }
 0x5ac   : > { %v1319_v3 = vadd.f32 %v1318_v2, %v1162_v62 }
 0x5ae   : > { %3201 = vtanh.f32 %v1319_v3  ;;  %v2181_v3 = vld [vmem:[%s2029_s11 + $0xa8] sm:$0xff] }
 0x5b8   : > { %v3202_v13 = vpop.eup %3201 }
 0x5b9   : > { %v1322_v11 = vmul.f32 %v3202_v13, %v1321_v8 }
 0x5bb   : > { %v4097_v18 = vadd.f32 %v1323_v14, %v1322_v11 }
 0x5bd   : > { %1327 = vst [vmem:[%s1326_s26] sm:$0xff] %v4097_v18  ;;  %1401 = vmatmul.mubr.f32.vlgmr.msra.gmra.mrb[10].mxu0 %v4097_v18  ;;  %2542 = vmatmul.mubr.f32.vlgmr.msra.gmra.mrb[10].mxu1 %v4097_v18  ;;  %s4203_s26 = scalar_lea.hbm %s4290_s4, %s2197_s16 }
 0x5be   : > { %2953 = vmatpush1.bf16.msra.mxu0 %v3720_v9  ;;  %2984 = vmatpush3.bf16.msra.mxu1 %v3751_v29 }
 0x5bf   : > { %2955 = vmatprep.subr.bf16.mxu0 %v3722_v10  ;;  %2985 = vmatprep.subr.bf16.mxu1 %v3448_v0 }
 0x5c0   : > { %1573 = vmatprep.mubr.f32.mxu0 %v3449_v1  ;;  %2576 = vmatprep.mubr.msk.f32.mxu1 %vm3450_vm0, %v3449_v1 }
 0x5c2   : > { %2957 = vmatpush1.bf16.msra.mxu0 %v3730_v15  ;;  %2987 = vmatpush3.bf16.msra.mxu1 %v3765_v37 }
 0x5c3   : > { %2959 = vmatprep.subr.bf16.mxu0 %v3733_v16  ;;  %2988 = vmatprep.subr.bf16.mxu1 %v3448_v0 }
 0x5c6   : > { %2961 = vmatpush1.bf16.msra.mxu0 %v3740_v21  ;;  %2990 = vmatpush3.bf16.msra.mxu1 %v3781_v46 }
 0x5c7   : > { %2963 = vmatprep.subr.bf16.mxu0 %v3743_v22  ;;  %2991 = vmatprep.subr.bf16.mxu1 %v3448_v0 }
 0x5ca   : > { %2965 = vmatpush1.bf16.msra.mxu0 %v3755_v31  ;;  %2993 = vmatpush3.bf16.msra.mxu1 %v3797_v55 }
 0x5cb   : > { %2967 = vmatprep.subr.bf16.mxu0 %v3759_v33  ;;  %2994 = vmatprep.subr.bf16.mxu1 %v3448_v0 }
 0x5ce   : > { %2969 = vmatpush1.bf16.msra.mxu0 %v3772_v41  ;;  %2996 = vmatpush3.bf16.msra.mxu1 %v3812_v63 }
 0x5cf   : > { %2971 = vmatprep.subr.bf16.mxu0 %v3775_v42  ;;  %2997 = vmatprep.subr.bf16.mxu1 %v3448_v0 }
 0x5d2   : > { %2973 = vmatpush1.bf16.msra.mxu0 %v3788_v50  ;;  %2999 = vmatpush3.bf16.msra.mxu1 %v3822_v6 }
 0x5d3   : > { %2975 = vmatprep.subr.bf16.mxu0 %v3791_v51  ;;  %3000 = vmatprep.subr.bf16.mxu1 %v3448_v0 }
 0x5d6   : > { %2977 = vmatpush1.bf16.msra.mxu0 %v3804_v59  ;;  %3002 = vmatpush3.bf16.msra.mxu1 %v3832_v12 }
 0x5d7   : > { %2979 = vmatprep.subr.bf16.mxu0 %v3807_v60  ;;  %3003 = vmatprep.subr.bf16.mxu1 %v3448_v0 }
 0x5da   : > { %2981 = vmatpush1.bf16.msra.mxu0 %v3818_v4  ;;  %3005 = vmatpush3.bf16.msra.mxu1 %v3842_v17 }
 0x5db   : > { %3007 = vmatprep.subr.bf16.mxu0 %v3715_v5  ;;  %3038 = vmatprep.subr.bf16.mxu1 %v3448_v0 }
 0x690   : > { %v1402_v20 = vpop.f32.mrb[10].mxu0  ;;  %v1473_v23 = vpop.f32.mrb[10].mxu1 }
 0x691   : > { %v1403_v24 = vadd.f32 %v1402_v20, %v3888_v25  ;;  %v1404_v27 = vpop.f32.mrb[11].mxu0  ;;  %v2543_v28 = vpop.f32.mrb[11].mxu1  ;;  %v1474_v44 = vadd.f32 %v1473_v23, %v3894_v49  ;;  %v2182_v20 = vld [vmem:[%s2029_s11 + $0xb0] sm:$0xff] }
 0x692   : > { %v1405_v30 = vadd.f32 %v1404_v27, %v3890_v26 }
 0x693   : > { %v1477_v32 = vadd.f32 %v2165_v19, %v1403_v24 }
 0x694   : > { %v1484_v36 = vadd.f32 %v2166_v34, %v1405_v30 }
 0x695   : > { %v2168_v35 = vmul.f32 -1.442695, %v1477_v32 }
 0x696   : > { %v2169_v5 = vmul.f32 -1.442695, %v1484_v36 }
 0x697   : > { %3203 = vpow2.f32 %v2168_v35 }
 0x698   : > { %3205 = vpow2.f32 %v2169_v5 }
 0x6a1   : > { %v3204_v38 = vpop.eup %3203 }
 0x6a2   : > { %v1481_v39 = vadd.f32 1.0, %v3204_v38  ;;  %v3206_v40 = vpop.eup %3205 }
 0x6a3   : > { %v1488_v43 = vadd.f32 1.0, %v3206_v40 }
 0x6a4   : > { %3207 = vrcp.f32 %v1481_v39 }
 0x6a5   : > { %3209 = vrcp.f32 %v1488_v43 }
 0x6ae   : > { %v3208_v45 = vpop.eup %3207 }
 0x6af   : > { %v1491_v48 = vmul.f32 %v3208_v45, %v1474_v44  ;;  %v3210_v53 = vpop.eup %3209 }
 0x6b0   : > { %v1494_v54 = vsub.f32 1.0, %v3210_v53  ;;  %v1496_v58 = vmul.f32 %v3210_v53, %v4097_v18 }
 0x6b1   : > { %v1492_v52 = vadd.f32 %v2167_v47, %v1491_v48 }
 0x6b3   : > { %3211 = vtanh.f32 %v1492_v52 }
 0x6bd   : > { %v3212_v56 = vpop.eup %3211 }
 0x6be   : > { %v1495_v57 = vmul.f32 %v3212_v56, %v1494_v54 }
 0x6c0   : > { %v4145_v61 = vadd.f32 %v1496_v58, %v1495_v57 }
 0x6c2   : > { %2171 = vst [vmem:[%s2017_s29 + $0x28] sm:$0xff] %v4145_v61  ;;  %1574 = vmatmul.mubr.f32.vlgmr.msra.gmra.mrb[12].mxu0 %v4145_v61  ;;  %2577 = vmatmul.mubr.f32.vlgmr.msra.gmra.mrb[12].mxu1 %v4145_v61 }
 0x6c3   : > { %3009 = vmatpush1.bf16.msra.mxu0 %v3720_v9  ;;  %3040 = vmatpush3.bf16.msra.mxu1 %v3751_v29 }
 0x6c4   : > { %3011 = vmatprep.subr.bf16.mxu0 %v3722_v10  ;;  %3041 = vmatprep.subr.bf16.mxu1 %v3448_v0 }
 0x6c5   : > { %1746 = vmatprep.mubr.f32.mxu0 %v3449_v1  ;;  %2611 = vmatprep.mubr.msk.f32.mxu1 %vm3450_vm0, %v3449_v1  ;;  %v2173_v1 = vld [vmem:[%s2021_s24 + $0x90] sm:$0xff] }
 0x6c7   : > { %3013 = vmatpush1.bf16.msra.mxu0 %v3730_v15  ;;  %3043 = vmatpush3.bf16.msra.mxu1 %v3765_v37 }
 0x6c8   : > { %3015 = vmatprep.subr.bf16.mxu0 %v3733_v16  ;;  %3044 = vmatprep.subr.bf16.mxu1 %v3448_v0 }
 0x6cb   : > { %3017 = vmatpush1.bf16.msra.mxu0 %v3740_v21  ;;  %3046 = vmatpush3.bf16.msra.mxu1 %v3781_v46 }
 0x6cc   : > { %3019 = vmatprep.subr.bf16.mxu0 %v3743_v22  ;;  %3047 = vmatprep.subr.bf16.mxu1 %v3448_v0 }
 0x6cf   : > { %3021 = vmatpush1.bf16.msra.mxu0 %v3755_v31  ;;  %3049 = vmatpush3.bf16.msra.mxu1 %v3797_v55  ;;  %v2174_v31 = vld [vmem:[%s2021_s24 + $0x98] sm:$0xff] }
 0x6d0   : > { %3023 = vmatprep.subr.bf16.mxu0 %v3759_v33  ;;  %3050 = vmatprep.subr.bf16.mxu1 %v3448_v0 }
 0x6d3   : > { %3025 = vmatpush1.bf16.msra.mxu0 %v3772_v41  ;;  %3052 = vmatpush3.bf16.msra.mxu1 %v3812_v63 }
 0x6d4   : > { %3027 = vmatprep.subr.bf16.mxu0 %v3775_v42  ;;  %3053 = vmatprep.subr.bf16.mxu1 %v3448_v0 }
 0x6d7   : > { %3029 = vmatpush1.bf16.msra.mxu0 %v3788_v50  ;;  %3055 = vmatpush3.bf16.msra.mxu1 %v3822_v6 }
 0x6d8   : > { %3031 = vmatprep.subr.bf16.mxu0 %v3791_v51  ;;  %3056 = vmatprep.subr.bf16.mxu1 %v3448_v0 }
 0x6db   : > { %3033 = vmatpush1.bf16.msra.mxu0 %v3804_v59  ;;  %3058 = vmatpush3.bf16.msra.mxu1 %v3832_v12  ;;  %v2175_v59 = vld [vmem:[%s2021_s24 + $0xa0] sm:$0xff]  ;;  %s1853_s24 = scalar_lea.sflag [#allocation5], %s3685_s20 }
 0x6dc   : > { %3035 = vmatprep.subr.bf16.mxu0 %v3807_v60  ;;  %3059 = vmatprep.subr.bf16.mxu1 %v3448_v0 }
 0x6df   : > { %3037 = vmatpush1.bf16.msra.mxu0 %v3818_v4  ;;  %3061 = vmatpush3.bf16.msra.mxu1 %v3842_v17 }
 0x795   : > { %v1575_v9 = vpop.f32.mrb[12].mxu0  ;;  %v1646_v10 = vpop.f32.mrb[12].mxu1 }
 0x796   : > { %v1576_v15 = vadd.f32 %v1575_v9, %v3888_v25  ;;  %v1577_v16 = vpop.f32.mrb[13].mxu0  ;;  %v2578_v21 = vpop.f32.mrb[13].mxu1  ;;  %v1647_v51 = vadd.f32 %v1646_v10, %v3894_v49 }
 0x797   : > { %v1578_v22 = vadd.f32 %v1577_v16, %v3890_v26 }
 0x798   : > { %v1650_v29 = vadd.f32 %v2173_v1, %v1576_v15 }
 0x799   : > { %v1657_v37 = vadd.f32 %v2174_v31, %v1578_v22 }
 0x79a   : > { %v2176_v33 = vmul.f32 -1.442695, %v1650_v29 }
 0x79b   : > { %v2177_v0 = vmul.f32 -1.442695, %v1657_v37 }
 0x79c   : > { %3213 = vpow2.f32 %v2176_v33 }
 0x79d   : > { %3215 = vpow2.f32 %v2177_v0 }
 0x7a6   : > { %v3214_v41 = vpop.eup %3213 }
 0x7a7   : > { %v1654_v42 = vadd.f32 1.0, %v3214_v41  ;;  %v3216_v46 = vpop.eup %3215 }
 0x7a8   : > { %v1661_v50 = vadd.f32 1.0, %v3216_v46 }
 0x7a9   : > { %3217 = vrcp.f32 %v1654_v42 }
 0x7aa   : > { %3219 = vrcp.f32 %v1661_v50 }
 0x7b3   : > { %v3218_v55 = vpop.eup %3217 }
 0x7b4   : > { %v1664_v60 = vmul.f32 %v3218_v55, %v1647_v51  ;;  %v3220_v4 = vpop.eup %3219 }
 0x7b5   : > { %v1667_v6 = vsub.f32 1.0, %v3220_v4  ;;  %v1669_v62 = vmul.f32 %v3220_v4, %v4145_v61 }
 0x7b6   : > { %v1665_v63 = vadd.f32 %v2175_v59, %v1664_v60 }
 0x7b8   : > { %3221 = vtanh.f32 %v1665_v63 }
 0x7c2   : > { %v3222_v12 = vpop.eup %3221 }
 0x7c3   : > { %v1668_v17 = vmul.f32 %v3222_v12, %v1667_v6 }
 0x7c5   : > { %v1670_v2 = vadd.f32 %v1669_v62, %v1668_v17 }
 0x7c7   : > { %2179 = vst [vmem:[%s2025_s10 + $0x30] sm:$0xff] %v1670_v2  ;;  %1747 = vmatmul.mubr.f32.vlgmr.msra.gmra.mrb[14].mxu0 %v1670_v2  ;;  %2612 = vmatmul.mubr.f32.vlgmr.msra.gmra.mrb[14].mxu1 %v1670_v2  ;;  %s3329_s10 = scalar_lea.vmem %s3328_s30, 2048 }
 0x7c8   : > { %p3331_p10 = scmp.lt.s32.totalorder %s3329_s10, %s3323_s21 }
 0x7ca   : > { %p3332_p13 = por %p3331_p10, %p3330_p9 }
 0x7cc   : > { %p3333_p5 = pnand %p3332_p13, %p3326_p8 }
 0x89a   : > { %v1748_v7 = vpop.f32.mrb[14].mxu0  ;;  %v1819_v8 = vpop.f32.mrb[14].mxu1 }
 0x89b   : > { %v1749_v13 = vadd.f32 %v1748_v7, %v3888_v25  ;;  %v1750_v11 = vpop.f32.mrb[15].mxu0  ;;  %v2613_v14 = vpop.f32.mrb[15].mxu1  ;;  %v1820_v34 = vadd.f32 %v1819_v8, %v3894_v49 }
 0x89c   : > { %v1751_v18 = vadd.f32 %v1750_v11, %v3890_v26  ;;  %v2183_v26 = vld [vmem:[%s2029_s11 + $0xb8] sm:$0xff] }
 0x89d   : > { %v1823_v19 = vadd.f32 %v2181_v3, %v1749_v13 }
 0x89e   : > { %v1830_v24 = vadd.f32 %v2182_v20, %v1751_v18 }
 0x89f   : > { %v2184_v23 = vmul.f32 -1.442695, %v1823_v19 }
 0x8a0   : > { %v2185_v27 = vmul.f32 -1.442695, %v1830_v24 }
 0x8a1   : > { %3223 = vpow2.f32 %v2184_v23 }
 0x8a2   : > { %3225 = vpow2.f32 %v2185_v27 }
 0x8ab   : > { %v3224_v28 = vpop.eup %3223 }
 0x8ac   : > { %v1827_v30 = vadd.f32 1.0, %v3224_v28  ;;  %v3226_v32 = vpop.eup %3225 }
 0x8ad   : > { %v1834_v25 = vadd.f32 1.0, %v3226_v32 }
 0x8ae   : > { %3227 = vrcp.f32 %v1827_v30 }
 0x8af   : > { %3229 = vrcp.f32 %v1834_v25 }
 0x8b8   : > { %v3228_v35 = vpop.eup %3227 }
 0x8b9   : > { %v1837_v36 = vmul.f32 %v3228_v35, %v1820_v34  ;;  %v3230_v38 = vpop.eup %3229 }
 0x8ba   : > { %v1840_v39 = vsub.f32 1.0, %v3230_v38  ;;  %v1842_v43 = vmul.f32 %v3230_v38, %v1670_v2 }
 0x8bb   : > { %v1838_v5 = vadd.f32 %v2183_v26, %v1837_v36 }
 0x8bd   : > { %3231 = vtanh.f32 %v1838_v5 }
 0x8c7   : > { %v3232_v40 = vpop.eup %3231 }
 0x8c8   : > { %v1841_v49 = vmul.f32 %v3232_v40, %v1840_v39 }
 0x8ca   : > { %v1843_v44 = vadd.f32 %v1842_v43, %v1841_v49 }
 0x8cc   : > { %2187 = vst [vmem:[%s2033_s13 + $0x38] sm:$0xff] %v1843_v44  ;;  %1851 = vst [vmem:[%s379_s0] sm:$0xff] %v1843_v44 }
 0x8cd   : > { %3336 = shalt.err (!%p3333_p5)
}
 0x8ce   : > { %s3337_s1 = scalar_lea.hbm %s4203_s26, 1024  ;;  %s3341_s16 = scalar_lea.hbm %s4290_s4, 2048 }
 0x8cf   : > { %p3338_p11 = scmp.ne.s32.totalorder %s4203_s26, %s3337_s1  ;;  %p3342_p3 = scmp.lt.u32.totalorder %s4203_s26, %s4290_s4 }
 0x8d0   : > { %p3343_p2 = scmp.lt.u32.totalorder %s3341_s16, %s3337_s1  ;;  %p3345_p7 = scmp.lt.u32.totalorder %s3337_s1, %s4203_s26 }
 0x8d1   : > { %p3339_p4 = pnand %p3338_p11, %p4314_p12 }
 0x8d2   : > { %p3344_p0 = por %p3343_p2, %p3342_p3 }
 0x8d3   : > { %p3340_p6 = pneg %p3339_p4 }
 0x8d4   : > { %p3346_p1 = por %p3345_p7, %p3344_p0 }
 0x8d6   : > { %p3347_p8 = pnand %p3346_p1, %p3340_p6 }
 0x8d8   : > { %3350 = shalt.err (!%p3347_p8)
}
 0x8d9   : > { %s3452_s7 = smov 128   ;;  %s3453_s27 = smov 8  }
 0x8da   : > { %3075 = dma.vmem_to_hbm [thread:$0]  (%p4314_p12), %s4208_s17, 1024, %s4203_s26, %s1853_s24, %s3452_s7, %s3452_s7, %s3453_s27  }
 0x8db   : > { %s1858_s0 = scalar_lea.sflag [#allocation11], %s3685_s20  ;;  %s3351_s15 = scalar_lea.vmem %s4215_s28, 128 }
 0x8dc   : > { %p3352_p9 = scmp.ne.s32.totalorder %s4215_s28, %s3351_s15  ;;  %s3454_s29 = smov [#allocation10]  }
 0x8dd   : > { %s3355_s21 = sshll.u32 %s3454_s29, 4  ;;  %s3356_s21 = int_to_ptr.vmem [resolvable:$false] %s3355_s21 }
 0x8de   : > { %p3353_p10 = pnand %p3352_p9, %p4314_p12  ;;  %s3357_s12 = scalar_lea.vmem %s3356_s21, 256 }
 0x8df   : > { %p3358_p5 = scmp.lt.s32.totalorder %s4215_s28, %s3356_s21  ;;  %p3359_p11 = scmp.lt.s32.totalorder %s3357_s12, %s3351_s15 }
 0x8e0   : > { %p3354_p13 = pneg %p3353_p10 }
 0x8e1   : > { %p3360_p4 = por %p3359_p11, %p3358_p5 }
 0x8e3   : > { %p3361_p6 = pnand %p3360_p4, %p3354_p13 }
 0x8e5   : > { %3364 = shalt.err (!%p3361_p6)
}
 0x8e6   : > { %s3365_s20 = scalar_lea.hbm %s4213_s25, 128  ;;  %s3369_s24 = scalar_lea.hbm %s4291_s5, 256 }
 0x8e7   : > { %p3366_p3 = scmp.ne.s32.totalorder %s4213_s25, %s3365_s20  ;;  %p3370_p7 = scmp.lt.u32.totalorder %s4213_s25, %s4291_s5 }
 0x8e8   : > { %p3371_p1 = scmp.lt.u32.totalorder %s3369_s24, %s3365_s20  ;;  %p3373_p9 = scmp.lt.u32.totalorder %s3365_s20, %s4213_s25 }
 0x8e9   : > { %p3367_p2 = pnand %p3366_p3, %p4314_p12 }
 0x8ea   : > { %p3372_p8 = por %p3371_p1, %p3370_p7 }
 0x8eb   : > { %p3368_p0 = pneg %p3367_p2 }
 0x8ec   : > { %p3374_p10 = por %p3373_p9, %p3372_p8 }
 0x8ee   : > { %p3375_p13 = pnand %p3374_p10, %p3368_p0 }
 0x8f0   : > { %3378 = shalt.err (!%p3375_p13)
}
 0x8f1   : > { %3076 = dma.vmem_to_hbm [thread:$0]  (%p4314_p12), %s4215_s28, 128, %s4213_s25, %s1858_s0  }
 0x8f2 PF: > { %s1905_s1 = sand.u32 1, %s3421_s18   ;;  %p4315_p5 = scmp.ne.s32.totalorder %s4304_s8, 0 }
 0x8f3   : > { %p4316_p11 = scmp.ge.s32.totalorder %s3441_s23, 2  ;;  %s1906_s11 = scalar_lea.sflag [#allocation5], %s1905_s1 }
 0x8f5   : > { %p3090_p4 = pnand %p4316_p11, %p4315_p5 }
 0x8f7   : > { %3412 = dma.done.wait (!%p3090_p4), %s1906_s11, 1024  }
 0x8f8   : > { %3414 = vsyncadd (!%p3090_p4), %s1906_s11, 4294966272  ;;  %s1915_s9 = scalar_lea.sflag [#allocation11], %s1905_s1 }
 0x8f9   : > { %3416 = dma.done.wait (!%p3090_p4), %s1915_s9, 128  }
 0x8fa   : > { %3418 = vsyncadd (!%p3090_p4), %s1915_s9, 4294967168  ;;  %s28_s23 = sadd.s32 1, %s3441_s23   ;;  %s4317_s6 = sld [smem:[#allocation16_spill]] }
 0x8fb   : > { %p25_p6 = scmp.ge.s32.totalorder %s28_s23, 4   ;;  %s4318_s20 = sld [smem:[#allocation18_spill]] }
 0x8fc   : > { %s4319_s28 = sld [smem:[#allocation17_spill]]  ;;  %s4320_s18 = smov %s3425_s19 }
 0x8fd   : > { %s4322_s21 = smov %s3437_s22  ;;  %27 = sbr.rel (!%p25_p6) target bundleno = 13 (0xd), region = 149 }
 0x900   : > { %s4321_s19 = smov %s4317_s6 }
 0x902   : > { %s4323_s22 = smov %s4319_s28 }
 0x904   :  { %1920 = vsyncpa [#allocation4], 1 }
 0x905   :  { %1922 = vsyncpa [#allocation4 + $0x1], 1 }
 0x906   :  { %1923 = vsyncpa [#allocation7], 1 }
 0x907   :  { %1925 = vsyncpa [#allocation7 + $0x1], 1 }
 0x908   :  { %1926 = vsyncpa [#allocation5], 1 }
 0x909   :  { %1928 = vsyncpa [#allocation5 + $0x1], 1 }
 0x90a   :  { %1929 = vsyncpa [#allocation11], 1 }
 0x90b   :  { %1931 = vsyncpa [#allocation11 + $0x1], 1 }

</bundles_post_ra>
